<compile_context>
chip_gen: v6e
topology: v6e:2x2x1
jax: 0.10.0
libtpu: 0.0.40
codegen_flags: <defaults>
</compile_context>

<pallas_src>
import functools

import jax
import jax.numpy as jnp
from jax.experimental import pallas as pl
from jax.experimental.pallas import tpu as pltpu


# ------------------------------ fused kernel --------------------------------

def _fused_kernel(x_ref, b1_ref, bmid_ref, b10_ref, bias_ref, alpha_ref,
                  o_ref, x1p_ref, xp_ref, ap_ref, *, H, W, C):
    """Whole Detection_ResNet_BN2 forward for one image, VMEM-resident.

    x_ref   : (H, W)            input image (Cin = 1)
    b1_ref  : (5, W, W*C)       banded conv1 weights (bf16)
    bmid_ref: (8, 3, W*C, W*C)  banded conv2..conv9 weights, BN scale folded (bf16)
    b10_ref : (3, W*C, W)       banded conv10 weights (bf16)
    bias_ref: (10, W*C)         row0=conv1 bias, rows1..8=BN bias 2..9, row9=conv10 bias
    alpha_ref: (4, W*C)         PReLU slopes for layers 2,4,6,8
    o_ref   : (H, W)            output image (Cout = 1)
    x1p_ref : (H+4, W)          sublane-padded conv1 input scratch
    xp_ref  : (H+2, W*C)        sublane-padded residual carrier x
    ap_ref  : (H+2, W*C)        sublane-padded intermediate a
    """
    f32 = jnp.float32
    bf16 = jnp.bfloat16
    WC = W * C

    # Zero the padded carriers; border rows stay zero (that IS the conv padding).
    # Interior rows are always overwritten before being read.
    x1p_ref[...] = jnp.zeros_like(x1p_ref)
    xp_ref[...] = jnp.zeros_like(xp_ref)
    ap_ref[...] = jnp.zeros_like(ap_ref)

    # ----------------- conv1: 5x5, 1 -> C, padding=2, + bias -----------------
    x1p_ref[2:2 + H, :] = x_ref[...]
    acc = jnp.zeros((H, WC), f32)
    for ky in range(5):
        acc += jnp.dot(x1p_ref[ky:ky + H, :].astype(bf16), b1_ref[ky],
                       preferred_element_type=f32)
    xp_ref[1:1 + H, :] = acc + bias_ref[0:1, :]

    def conv3x3(src_ref, li):
        """Banded 3x3 conv: three (H, W*C) @ (W*C, W*C) bf16 MXU matmuls."""
        a = jnp.zeros((H, WC), f32)
        for ky in range(3):
            a += jnp.dot(src_ref[ky:ky + H, :].astype(bf16), bmid_ref[li, ky],
                         preferred_element_type=f32)
        return a

    # ------------- 4 residual blocks: conv{2k}+BN+PReLU, conv{2k+1}+BN -------
    for bi in range(4):
        la = 2 * bi        # conv 2 / 4 / 6 / 8   (BN scale already in weights)
        lb = 2 * bi + 1    # conv 3 / 5 / 7 / 9
        a = conv3x3(xp_ref, la) + bias_ref[1 + la:2 + la, :]
        a = jnp.where(a >= 0.0, a, alpha_ref[bi:bi + 1, :] * a)     # PReLU
        ap_ref[1:1 + H, :] = a
        r = conv3x3(ap_ref, lb) + bias_ref[1 + lb:2 + lb, :]
        xp_ref[1:1 + H, :] = xp_ref[1:1 + H, :] + r                 # residual add

    # ----------------- conv10: 3x3, C -> 1, padding=1, + bias ----------------
    acc10 = jnp.zeros((H, W), f32)
    for ky in range(3):
        acc10 += jnp.dot(xp_ref[ky:ky + H, :].astype(bf16), b10_ref[ky],
                         preferred_element_type=f32)
    o_ref[...] = acc10 + bias_ref[9:10, 0:W]


# ------------------------------- forward ------------------------------------

def detection_resnet_bn2_forward(params, x_nchw, width):
    N, Cin, H, W = x_nchw.shape
    assert Cin == 1
    C = width
    WC = W * C
    f32 = jnp.float32
    hi = jax.lax.Precision.HIGHEST

    x = x_nchw.reshape(N, H, W).astype(f32)

    # ---- banded weight matrices (lane layout: activation lane = w*C + c) ----
    # S*[kx, wi, w] = 1 iff input column wi feeds output column w through tap kx.
    S3 = (jnp.arange(W)[None, :, None] ==
          (jnp.arange(W)[None, None, :] + jnp.arange(3)[:, None, None] - 1)).astype(f32)
    S5 = (jnp.arange(W)[None, :, None] ==
          (jnp.arange(W)[None, None, :] + jnp.arange(5)[:, None, None] - 2)).astype(f32)

    w1t = jnp.transpose(params['conv1_w'][:, 0], (1, 2, 0))            # (5,5,C)  ky,kx,co
    b1m = jnp.einsum('xiw,yxd->yiwd', S5, w1t, precision=hi).reshape(5, W, WC)

    # conv2..9 weights with eval-mode BN scale folded into the output channels.
    wmid_list = []
    for i in range(2, 10):
        wt = jnp.transpose(params[f'conv{i}_w'], (2, 3, 1, 0))         # (3,3,Cin,Cout)
        wt = wt * params[f'bn{i}_scale'][None, None, None, :]
        wmid_list.append(wt)
    wmid = jnp.stack(wmid_list)                                        # (8,3,3,C,C)
    bmid = jnp.einsum('xiw,lyxcd->lyicwd', S3, wmid,
                      precision=hi).reshape(8, 3, WC, WC)

    w10t = jnp.transpose(params['conv10_w'][0], (1, 2, 0))             # (3,3,C)  ky,kx,c
    b10m = jnp.einsum('xiw,yxc->yicw', S3, w10t, precision=hi).reshape(3, WC, W)

    # bf16 operands for the MXU (accumulation stays f32 inside the kernel).
    b1m = b1m.astype(jnp.bfloat16)
    bmid = bmid.astype(jnp.bfloat16)
    b10m = b10m.astype(jnp.bfloat16)

    # ---- per-channel bias / PReLU tables, tiled to the lane layout (w*C+c) --
    bias_tab = jnp.stack([jnp.tile(params['conv1_b'], W)] +
                         [jnp.tile(params[f'bn{i}_bias'], W) for i in range(2, 10)] +
                         [jnp.full((WC,), params['conv10_b'][0])]).astype(f32)   # (10, WC)
    alpha_tab = jnp.stack([jnp.tile(params[f'alpha{i}'], W)
                           for i in (2, 4, 6, 8)]).astype(f32)          # (4, WC)

    kernel = functools.partial(_fused_kernel, H=H, W=W, C=C)

    y = pl.pallas_call(
        kernel,
        out_shape=jax.ShapeDtypeStruct((N, H, W), f32),
        grid=(N,),
        in_specs=[
            pl.BlockSpec((None, H, W), lambda n: (n, 0, 0)),
            pl.BlockSpec((5, W, WC), lambda n: (0, 0, 0)),
            pl.BlockSpec((8, 3, WC, WC), lambda n: (0, 0, 0, 0)),
            pl.BlockSpec((3, WC, W), lambda n: (0, 0, 0)),
            pl.BlockSpec((10, WC), lambda n: (0, 0)),
            pl.BlockSpec((4, WC), lambda n: (0, 0)),
        ],
        out_specs=pl.BlockSpec((None, H, W), lambda n: (n, 0, 0)),
        scratch_shapes=[
            pltpu.VMEM((H + 4, W), f32),      # conv1 padded input
            pltpu.VMEM((H + 2, WC), f32),     # residual carrier x (padded)
            pltpu.VMEM((H + 2, WC), f32),     # intermediate a (padded)
        ],
        compiler_params=pltpu.CompilerParams(dimension_semantics=("parallel",)),
    )(x, b1m, bmid, b10m, bias_tab, alpha_tab)

    return y.reshape(N, 1, H, W)


# ----------------------------- parameters -----------------------------------

def init_params(key, width):
    eps = 1e-5
    p = {}
    keys = iter(jax.random.split(key, 64))

    def nrm(k, shape, s=0.1):
        return s * jax.random.normal(k, shape, jnp.float32)

    p['conv1_w'] = nrm(next(keys), (width, 1, 5, 5))
    p['conv1_b'] = nrm(next(keys), (width,))
    for i in range(2, 10):
        p[f'conv{i}_w'] = nrm(next(keys), (width, width, 3, 3))
        gamma = 1.0 + 0.1 * jax.random.normal(next(keys), (width,), jnp.float32)
        beta = nrm(next(keys), (width,))
        mean = nrm(next(keys), (width,))
        var = jnp.abs(nrm(next(keys), (width,))) + 0.5
        scale = gamma / jnp.sqrt(var + eps)          # eval-mode BN fold
        p[f'bn{i}_scale'] = scale
        p[f'bn{i}_bias'] = beta - mean * scale
    for i in (2, 4, 6, 8):
        p[f'alpha{i}'] = jnp.full((width,), 0.25, jnp.float32) + nrm(next(keys), (width,), 0.01)
    p['conv10_w'] = nrm(next(keys), (1, width, 3, 3))
    p['conv10_b'] = nrm(next(keys), (1,))
    return p


# --------------------------- pure-JAX reference ------------------------------

def _conv_ref(x, w, scale, bias, alpha=None, residual=None):
    w_hwio = jnp.transpose(w, (2, 3, 1, 0))
    y = jax.lax.conv_general_dilated(
        x, w_hwio, window_strides=(1, 1), padding='SAME',
        dimension_numbers=('NHWC', 'HWIO', 'NHWC'),
        precision=jax.lax.Precision.HIGHEST)
    y = y * scale + bias
    if alpha is not None:
        y = jnp.where(y >= 0.0, y, alpha * y)
    if residual is not None:
        y = y + residual
    return y


def forward_ref(params, x_nchw, width):
    x = jnp.transpose(x_nchw, (0, 2, 3, 1)).astype(jnp.float32)
    one_w = jnp.ones((width,), jnp.float32)
    x = _conv_ref(x, params['conv1_w'], one_w, params['conv1_b'])
    for blk in (2, 4, 6, 8):
        a = _conv_ref(x, params[f'conv{blk}_w'],
                      params[f'bn{blk}_scale'], params[f'bn{blk}_bias'],
                      alpha=params[f'alpha{blk}'])
        x = _conv_ref(a, params[f'conv{blk + 1}_w'],
                      params[f'bn{blk + 1}_scale'], params[f'bn{blk + 1}_bias'],
                      residual=x)
    y = _conv_ref(x, params['conv10_w'], jnp.ones((1,), jnp.float32), params['conv10_b'])
    return jnp.transpose(y, (0, 3, 1, 2))


if __name__ == "__main__":
    width = 8
    key = jax.random.PRNGKey(0)
    kp, kx = jax.random.split(key)
    params = init_params(kp, width)
    x = jax.random.normal(kx, (2, 1, 16, 16), jnp.float32)   # NCHW, like the PyTorch module

    fwd = jax.jit(functools.partial(detection_resnet_bn2_forward, width=width))
    y = fwd(params, x)
    jax.block_until_ready(y)

    y_ref = forward_ref(params, x, width)
    assert y.shape == (2, 1, 16, 16), y.shape
    max_err = float(jnp.max(jnp.abs(y - y_ref)))
    # Kernel uses bf16 MXU operands with f32 accumulation; reference is
    # f32/HIGHEST, so tolerance is relaxed accordingly.
    assert jnp.allclose(y, y_ref, atol=5e-2, rtol=5e-2), f"max_err={max_err}"
    print("KERNEL_OK")
</pallas_src>

<mosaic_0001>
module attributes {stable_mosaic.version = 11 : i64} {
  func.func @_fused_kernel(%arg0: i32, %arg1: memref<1x16x16xf32, #tpu.memory_space<vmem>>, %arg2: memref<5x16x128xbf16, #tpu.memory_space<vmem>>, %arg3: memref<8x3x128x128xbf16, #tpu.memory_space<vmem>>, %arg4: memref<3x128x16xbf16, #tpu.memory_space<vmem>>, %arg5: memref<10x128xf32, #tpu.memory_space<vmem>>, %arg6: memref<4x128xf32, #tpu.memory_space<vmem>>, %arg7: memref<1x16x16xf32, #tpu.memory_space<vmem>>, %arg8: memref<20x16xf32, #tpu.memory_space<vmem>>, %arg9: memref<18x128xf32, #tpu.memory_space<vmem>>, %arg10: memref<18x128xf32, #tpu.memory_space<vmem>>) attributes {dimension_semantics = [#tpu.dimension_semantics<parallel>], iteration_bounds = array<i64: 2>, scalar_prefetch = 0 : i64, scratch_operands = 3 : i64, tpu.core_type = #tpu.core_type<tc>, window_params = [{transform_indices = @transform_0, window_bounds = array<i64: 1, 16, 16>}, {pipeline_mode = #tpu.pipeline_mode<synchronous>, transform_indices = @transform_1, window_bounds = array<i64: 5, 16, 128>}, {pipeline_mode = #tpu.pipeline_mode<synchronous>, transform_indices = @transform_2, window_bounds = array<i64: 8, 3, 128, 128>}, {pipeline_mode = #tpu.pipeline_mode<synchronous>, transform_indices = @transform_3, window_bounds = array<i64: 3, 128, 16>}, {pipeline_mode = #tpu.pipeline_mode<synchronous>, transform_indices = @transform_4, window_bounds = array<i64: 10, 128>}, {pipeline_mode = #tpu.pipeline_mode<synchronous>, transform_indices = @transform_5, window_bounds = array<i64: 4, 128>}, {transform_indices = @transform_6, window_bounds = array<i64: 1, 16, 16>}]} {
    %cst = arith.constant 0.000000e+00 : f32
    %0 = vector.broadcast %cst : f32 to vector<20x16xf32>
    %c0 = arith.constant 0 : index
    %c0_0 = arith.constant 0 : index
    %1 = vector.load %arg8[%c0, %c0_0] : memref<20x16xf32, #tpu.memory_space<vmem>>, vector<20x16xf32>
    tpu.vector_store %arg8[%c0, %c0_0], %0 {strides = array<i32>} : memref<20x16xf32, #tpu.memory_space<vmem>>, vector<20x16xf32>,
    %cst_1 = arith.constant 0.000000e+00 : f32
    %2 = vector.broadcast %cst_1 : f32 to vector<18x128xf32>
    %c0_2 = arith.constant 0 : index
    %c0_3 = arith.constant 0 : index
    %3 = vector.load %arg9[%c0_2, %c0_3] : memref<18x128xf32, #tpu.memory_space<vmem>>, vector<18x128xf32>
    tpu.vector_store %arg9[%c0_2, %c0_3], %2 {strides = array<i32>} : memref<18x128xf32, #tpu.memory_space<vmem>>, vector<18x128xf32>,
    %cst_4 = arith.constant 0.000000e+00 : f32
    %4 = vector.broadcast %cst_4 : f32 to vector<18x128xf32>
    %c0_5 = arith.constant 0 : index
    %c0_6 = arith.constant 0 : index
    %5 = vector.load %arg10[%c0_5, %c0_6] : memref<18x128xf32, #tpu.memory_space<vmem>>, vector<18x128xf32>
    tpu.vector_store %arg10[%c0_5, %c0_6], %4 {strides = array<i32>} : memref<18x128xf32, #tpu.memory_space<vmem>>, vector<18x128xf32>,
    %c0_7 = arith.constant 0 : index
    %c0_8 = arith.constant 0 : index
    %c0_9 = arith.constant 0 : index
    %6 = vector.load %arg1[%c0_7, %c0_8, %c0_9] : memref<1x16x16xf32, #tpu.memory_space<vmem>>, vector<1x16x16xf32>
    %7 = vector.shape_cast %6 : vector<1x16x16xf32> to vector<16x16xf32>
    %c2 = arith.constant 2 : index
    %c0_10 = arith.constant 0 : index
    %8 = vector.load %arg8[%c2, %c0_10] : memref<20x16xf32, #tpu.memory_space<vmem>>, vector<16x16xf32>
    tpu.vector_store %arg8[%c2, %c0_10], %7 {strides = array<i32>} : memref<20x16xf32, #tpu.memory_space<vmem>>, vector<16x16xf32>,
    %cst_11 = arith.constant 0.000000e+00 : f32
    %9 = vector.broadcast %cst_11 : f32 to vector<16x128xf32>
    %c0_12 = arith.constant 0 : index
    %c0_13 = arith.constant 0 : index
    %10 = vector.load %arg8[%c0_12, %c0_13] : memref<20x16xf32, #tpu.memory_space<vmem>>, vector<16x16xf32>
    %11 = arith.truncf %10 : vector<16x16xf32> to vector<16x16xbf16>
    %c0_14 = arith.constant 0 : index
    %c0_15 = arith.constant 0 : index
    %c0_16 = arith.constant 0 : index
    %12 = vector.load %arg2[%c0_14, %c0_15, %c0_16] : memref<5x16x128xbf16, #tpu.memory_space<vmem>>, vector<1x16x128xbf16>
    %13 = vector.shape_cast %12 : vector<1x16x128xbf16> to vector<16x128xbf16>
    %cst_17 = arith.constant dense<0.000000e+00> : vector<16x128xf32>
    %14 = tpu.matmul %11, %13, %cst_17 {dimension_numbers = #tpu.dot_dimension_numbers<[1], [0], [0], [1], [0, 0, 1, 1], [], []>} : vector<16x16xbf16>, vector<16x128xbf16>, vector<16x128xf32> -> vector<16x128xf32>
    %15 = arith.addf %9, %14 : vector<16x128xf32>
    %c1 = arith.constant 1 : index
    %c0_18 = arith.constant 0 : index
    %16 = vector.load %arg8[%c1, %c0_18] : memref<20x16xf32, #tpu.memory_space<vmem>>, vector<16x16xf32>
    %17 = arith.truncf %16 : vector<16x16xf32> to vector<16x16xbf16>
    %c1_19 = arith.constant 1 : index
    %c0_20 = arith.constant 0 : index
    %c0_21 = arith.constant 0 : index
    %18 = vector.load %arg2[%c1_19, %c0_20, %c0_21] : memref<5x16x128xbf16, #tpu.memory_space<vmem>>, vector<1x16x128xbf16>
    %19 = vector.shape_cast %18 : vector<1x16x128xbf16> to vector<16x128xbf16>
    %cst_22 = arith.constant dense<0.000000e+00> : vector<16x128xf32>
    %20 = tpu.matmul %17, %19, %cst_22 {dimension_numbers = #tpu.dot_dimension_numbers<[1], [0], [0], [1], [0, 0, 1, 1], [], []>} : vector<16x16xbf16>, vector<16x128xbf16>, vector<16x128xf32> -> vector<16x128xf32>
    %21 = arith.addf %15, %20 : vector<16x128xf32>
    %c2_23 = arith.constant 2 : index
    %c0_24 = arith.constant 0 : index
    %22 = vector.load %arg8[%c2_23, %c0_24] : memref<20x16xf32, #tpu.memory_space<vmem>>, vector<16x16xf32>
    %23 = arith.truncf %22 : vector<16x16xf32> to vector<16x16xbf16>
    %c2_25 = arith.constant 2 : index
    %c0_26 = arith.constant 0 : index
    %c0_27 = arith.constant 0 : index
    %24 = vector.load %arg2[%c2_25, %c0_26, %c0_27] : memref<5x16x128xbf16, #tpu.memory_space<vmem>>, vector<1x16x128xbf16>
    %25 = vector.shape_cast %24 : vector<1x16x128xbf16> to vector<16x128xbf16>
    %cst_28 = arith.constant dense<0.000000e+00> : vector<16x128xf32>
    %26 = tpu.matmul %23, %25, %cst_28 {dimension_numbers = #tpu.dot_dimension_numbers<[1], [0], [0], [1], [0, 0, 1, 1], [], []>} : vector<16x16xbf16>, vector<16x128xbf16>, vector<16x128xf32> -> vector<16x128xf32>
    %27 = arith.addf %21, %26 : vector<16x128xf32>
    %c3 = arith.constant 3 : index
    %c0_29 = arith.constant 0 : index
    %28 = vector.load %arg8[%c3, %c0_29] : memref<20x16xf32, #tpu.memory_space<vmem>>, vector<16x16xf32>
    %29 = arith.truncf %28 : vector<16x16xf32> to vector<16x16xbf16>
    %c3_30 = arith.constant 3 : index
    %c0_31 = arith.constant 0 : index
    %c0_32 = arith.constant 0 : index
    %30 = vector.load %arg2[%c3_30, %c0_31, %c0_32] : memref<5x16x128xbf16, #tpu.memory_space<vmem>>, vector<1x16x128xbf16>
    %31 = vector.shape_cast %30 : vector<1x16x128xbf16> to vector<16x128xbf16>
    %cst_33 = arith.constant dense<0.000000e+00> : vector<16x128xf32>
    %32 = tpu.matmul %29, %31, %cst_33 {dimension_numbers = #tpu.dot_dimension_numbers<[1], [0], [0], [1], [0, 0, 1, 1], [], []>} : vector<16x16xbf16>, vector<16x128xbf16>, vector<16x128xf32> -> vector<16x128xf32>
    %33 = arith.addf %27, %32 : vector<16x128xf32>
    %c4 = arith.constant 4 : index
    %c0_34 = arith.constant 0 : index
    %34 = vector.load %arg8[%c4, %c0_34] : memref<20x16xf32, #tpu.memory_space<vmem>>, vector<16x16xf32>
    %35 = arith.truncf %34 : vector<16x16xf32> to vector<16x16xbf16>
    %c4_35 = arith.constant 4 : index
    %c0_36 = arith.constant 0 : index
    %c0_37 = arith.constant 0 : index
    %36 = vector.load %arg2[%c4_35, %c0_36, %c0_37] : memref<5x16x128xbf16, #tpu.memory_space<vmem>>, vector<1x16x128xbf16>
    %37 = vector.shape_cast %36 : vector<1x16x128xbf16> to vector<16x128xbf16>
    %cst_38 = arith.constant dense<0.000000e+00> : vector<16x128xf32>
    %38 = tpu.matmul %35, %37, %cst_38 {dimension_numbers = #tpu.dot_dimension_numbers<[1], [0], [0], [1], [0, 0, 1, 1], [], []>} : vector<16x16xbf16>, vector<16x128xbf16>, vector<16x128xf32> -> vector<16x128xf32>
    %39 = arith.addf %33, %38 : vector<16x128xf32>
    %c0_39 = arith.constant 0 : index
    %c0_40 = arith.constant 0 : index
    %40 = vector.load %arg5[%c0_39, %c0_40] : memref<10x128xf32, #tpu.memory_space<vmem>>, vector<1x128xf32>
    %41 = vector.broadcast %40 : vector<1x128xf32> to vector<16x128xf32>
    %42 = arith.addf %39, %41 : vector<16x128xf32>
    %c1_41 = arith.constant 1 : index
    %c0_42 = arith.constant 0 : index
    %43 = vector.load %arg9[%c1_41, %c0_42] : memref<18x128xf32, #tpu.memory_space<vmem>>, vector<16x128xf32>
    tpu.vector_store %arg9[%c1_41, %c0_42], %42 {strides = array<i32>} : memref<18x128xf32, #tpu.memory_space<vmem>>, vector<16x128xf32>,
    %cst_43 = arith.constant 0.000000e+00 : f32
    %44 = vector.broadcast %cst_43 : f32 to vector<16x128xf32>
    %c0_44 = arith.constant 0 : index
    %c0_45 = arith.constant 0 : index
    %45 = vector.load %arg9[%c0_44, %c0_45] : memref<18x128xf32, #tpu.memory_space<vmem>>, vector<16x128xf32>
    %46 = arith.truncf %45 : vector<16x128xf32> to vector<16x128xbf16>
    %c0_46 = arith.constant 0 : index
    %c0_47 = arith.constant 0 : index
    %c0_48 = arith.constant 0 : index
    %c0_49 = arith.constant 0 : index
    %47 = vector.load %arg3[%c0_46, %c0_47, %c0_48, %c0_49] : memref<8x3x128x128xbf16, #tpu.memory_space<vmem>>, vector<1x1x128x128xbf16>
    %48 = vector.shape_cast %47 : vector<1x1x128x128xbf16> to vector<128x128xbf16>
    %cst_50 = arith.constant dense<0.000000e+00> : vector<16x128xf32>
    %49 = tpu.matmul %46, %48, %cst_50 {dimension_numbers = #tpu.dot_dimension_numbers<[1], [0], [0], [1], [0, 0, 1, 1], [], []>} : vector<16x128xbf16>, vector<128x128xbf16>, vector<16x128xf32> -> vector<16x128xf32>
    %50 = arith.addf %44, %49 : vector<16x128xf32>
    %c1_51 = arith.constant 1 : index
    %c0_52 = arith.constant 0 : index
    %51 = vector.load %arg9[%c1_51, %c0_52] : memref<18x128xf32, #tpu.memory_space<vmem>>, vector<16x128xf32>
    %52 = arith.truncf %51 : vector<16x128xf32> to vector<16x128xbf16>
    %c0_53 = arith.constant 0 : index
    %c1_54 = arith.constant 1 : index
    %c0_55 = arith.constant 0 : index
    %c0_56 = arith.constant 0 : index
    %53 = vector.load %arg3[%c0_53, %c1_54, %c0_55, %c0_56] : memref<8x3x128x128xbf16, #tpu.memory_space<vmem>>, vector<1x1x128x128xbf16>
    %54 = vector.shape_cast %53 : vector<1x1x128x128xbf16> to vector<128x128xbf16>
    %cst_57 = arith.constant dense<0.000000e+00> : vector<16x128xf32>
    %55 = tpu.matmul %52, %54, %cst_57 {dimension_numbers = #tpu.dot_dimension_numbers<[1], [0], [0], [1], [0, 0, 1, 1], [], []>} : vector<16x128xbf16>, vector<128x128xbf16>, vector<16x128xf32> -> vector<16x128xf32>
    %56 = arith.addf %50, %55 : vector<16x128xf32>
    %c2_58 = arith.constant 2 : index
    %c0_59 = arith.constant 0 : index
    %57 = vector.load %arg9[%c2_58, %c0_59] : memref<18x128xf32, #tpu.memory_space<vmem>>, vector<16x128xf32>
    %58 = arith.truncf %57 : vector<16x128xf32> to vector<16x128xbf16>
    %c0_60 = arith.constant 0 : index
    %c2_61 = arith.constant 2 : index
    %c0_62 = arith.constant 0 : index
    %c0_63 = arith.constant 0 : index
    %59 = vector.load %arg3[%c0_60, %c2_61, %c0_62, %c0_63] : memref<8x3x128x128xbf16, #tpu.memory_space<vmem>>, vector<1x1x128x128xbf16>
    %60 = vector.shape_cast %59 : vector<1x1x128x128xbf16> to vector<128x128xbf16>
    %cst_64 = arith.constant dense<0.000000e+00> : vector<16x128xf32>
    %61 = tpu.matmul %58, %60, %cst_64 {dimension_numbers = #tpu.dot_dimension_numbers<[1], [0], [0], [1], [0, 0, 1, 1], [], []>} : vector<16x128xbf16>, vector<128x128xbf16>, vector<16x128xf32> -> vector<16x128xf32>
    %62 = arith.addf %56, %61 : vector<16x128xf32>
    %c1_65 = arith.constant 1 : index
    %c0_66 = arith.constant 0 : index
    %63 = vector.load %arg5[%c1_65, %c0_66] : memref<10x128xf32, #tpu.memory_space<vmem>>, vector<1x128xf32>
    %64 = vector.broadcast %63 : vector<1x128xf32> to vector<16x128xf32>
    %65 = arith.addf %62, %64 : vector<16x128xf32>
    %cst_67 = arith.constant 0.000000e+00 : f32
    %66 = vector.broadcast %cst_67 : f32 to vector<16x128xf32>
    %67 = arith.cmpf oge, %65, %66 : vector<16x128xf32>
    %c0_68 = arith.constant 0 : index
    %c0_69 = arith.constant 0 : index
    %68 = vector.load %arg6[%c0_68, %c0_69] : memref<4x128xf32, #tpu.memory_space<vmem>>, vector<1x128xf32>
    %69 = vector.broadcast %68 : vector<1x128xf32> to vector<16x128xf32>
    %70 = arith.mulf %69, %65 : vector<16x128xf32>
    %71 = arith.select %67, %65, %70 : vector<16x128xi1>, vector<16x128xf32>
    %c1_70 = arith.constant 1 : index
    %c0_71 = arith.constant 0 : index
    %72 = vector.load %arg10[%c1_70, %c0_71] : memref<18x128xf32, #tpu.memory_space<vmem>>, vector<16x128xf32>
    tpu.vector_store %arg10[%c1_70, %c0_71], %71 {strides = array<i32>} : memref<18x128xf32, #tpu.memory_space<vmem>>, vector<16x128xf32>,
    %cst_72 = arith.constant 0.000000e+00 : f32
    %73 = vector.broadcast %cst_72 : f32 to vector<16x128xf32>
    %c0_73 = arith.constant 0 : index
    %c0_74 = arith.constant 0 : index
    %74 = vector.load %arg10[%c0_73, %c0_74] : memref<18x128xf32, #tpu.memory_space<vmem>>, vector<16x128xf32>
    %75 = arith.truncf %74 : vector<16x128xf32> to vector<16x128xbf16>
    %c1_75 = arith.constant 1 : index
    %c0_76 = arith.constant 0 : index
    %c0_77 = arith.constant 0 : index
    %c0_78 = arith.constant 0 : index
    %76 = vector.load %arg3[%c1_75, %c0_76, %c0_77, %c0_78] : memref<8x3x128x128xbf16, #tpu.memory_space<vmem>>, vector<1x1x128x128xbf16>
    %77 = vector.shape_cast %76 : vector<1x1x128x128xbf16> to vector<128x128xbf16>
    %cst_79 = arith.constant dense<0.000000e+00> : vector<16x128xf32>
    %78 = tpu.matmul %75, %77, %cst_79 {dimension_numbers = #tpu.dot_dimension_numbers<[1], [0], [0], [1], [0, 0, 1, 1], [], []>} : vector<16x128xbf16>, vector<128x128xbf16>, vector<16x128xf32> -> vector<16x128xf32>
    %79 = arith.addf %73, %78 : vector<16x128xf32>
    %c1_80 = arith.constant 1 : index
    %c0_81 = arith.constant 0 : index
    %80 = vector.load %arg10[%c1_80, %c0_81] : memref<18x128xf32, #tpu.memory_space<vmem>>, vector<16x128xf32>
    %81 = arith.truncf %80 : vector<16x128xf32> to vector<16x128xbf16>
    %c1_82 = arith.constant 1 : index
    %c1_83 = arith.constant 1 : index
    %c0_84 = arith.constant 0 : index
    %c0_85 = arith.constant 0 : index
    %82 = vector.load %arg3[%c1_82, %c1_83, %c0_84, %c0_85] : memref<8x3x128x128xbf16, #tpu.memory_space<vmem>>, vector<1x1x128x128xbf16>
    %83 = vector.shape_cast %82 : vector<1x1x128x128xbf16> to vector<128x128xbf16>
    %cst_86 = arith.constant dense<0.000000e+00> : vector<16x128xf32>
    %84 = tpu.matmul %81, %83, %cst_86 {dimension_numbers = #tpu.dot_dimension_numbers<[1], [0], [0], [1], [0, 0, 1, 1], [], []>} : vector<16x128xbf16>, vector<128x128xbf16>, vector<16x128xf32> -> vector<16x128xf32>
    %85 = arith.addf %79, %84 : vector<16x128xf32>
    %c2_87 = arith.constant 2 : index
    %c0_88 = arith.constant 0 : index
    %86 = vector.load %arg10[%c2_87, %c0_88] : memref<18x128xf32, #tpu.memory_space<vmem>>, vector<16x128xf32>
    %87 = arith.truncf %86 : vector<16x128xf32> to vector<16x128xbf16>
    %c1_89 = arith.constant 1 : index
    %c2_90 = arith.constant 2 : index
    %c0_91 = arith.constant 0 : index
    %c0_92 = arith.constant 0 : index
    %88 = vector.load %arg3[%c1_89, %c2_90, %c0_91, %c0_92] : memref<8x3x128x128xbf16, #tpu.memory_space<vmem>>, vector<1x1x128x128xbf16>
    %89 = vector.shape_cast %88 : vector<1x1x128x128xbf16> to vector<128x128xbf16>
    %cst_93 = arith.constant dense<0.000000e+00> : vector<16x128xf32>
    %90 = tpu.matmul %87, %89, %cst_93 {dimension_numbers = #tpu.dot_dimension_numbers<[1], [0], [0], [1], [0, 0, 1, 1], [], []>} : vector<16x128xbf16>, vector<128x128xbf16>, vector<16x128xf32> -> vector<16x128xf32>
    %91 = arith.addf %85, %90 : vector<16x128xf32>
    %c2_94 = arith.constant 2 : index
    %c0_95 = arith.constant 0 : index
    %92 = vector.load %arg5[%c2_94, %c0_95] : memref<10x128xf32, #tpu.memory_space<vmem>>, vector<1x128xf32>
    %93 = vector.broadcast %92 : vector<1x128xf32> to vector<16x128xf32>
    %94 = arith.addf %91, %93 : vector<16x128xf32>
    %c1_96 = arith.constant 1 : index
    %c0_97 = arith.constant 0 : index
    %95 = vector.load %arg9[%c1_96, %c0_97] : memref<18x128xf32, #tpu.memory_space<vmem>>, vector<16x128xf32>
    %96 = arith.addf %95, %94 : vector<16x128xf32>
    %c1_98 = arith.constant 1 : index
    %c0_99 = arith.constant 0 : index
    %97 = vector.load %arg9[%c1_98, %c0_99] : memref<18x128xf32, #tpu.memory_space<vmem>>, vector<16x128xf32>
    tpu.vector_store %arg9[%c1_98, %c0_99], %96 {strides = array<i32>} : memref<18x128xf32, #tpu.memory_space<vmem>>, vector<16x128xf32>,
    %cst_100 = arith.constant 0.000000e+00 : f32
    %98 = vector.broadcast %cst_100 : f32 to vector<16x128xf32>
    %c0_101 = arith.constant 0 : index
    %c0_102 = arith.constant 0 : index
    %99 = vector.load %arg9[%c0_101, %c0_102] : memref<18x128xf32, #tpu.memory_space<vmem>>, vector<16x128xf32>
    %100 = arith.truncf %99 : vector<16x128xf32> to vector<16x128xbf16>
    %c2_103 = arith.constant 2 : index
    %c0_104 = arith.constant 0 : index
    %c0_105 = arith.constant 0 : index
    %c0_106 = arith.constant 0 : index
    %101 = vector.load %arg3[%c2_103, %c0_104, %c0_105, %c0_106] : memref<8x3x128x128xbf16, #tpu.memory_space<vmem>>, vector<1x1x128x128xbf16>
    %102 = vector.shape_cast %101 : vector<1x1x128x128xbf16> to vector<128x128xbf16>
    %cst_107 = arith.constant dense<0.000000e+00> : vector<16x128xf32>
    %103 = tpu.matmul %100, %102, %cst_107 {dimension_numbers = #tpu.dot_dimension_numbers<[1], [0], [0], [1], [0, 0, 1, 1], [], []>} : vector<16x128xbf16>, vector<128x128xbf16>, vector<16x128xf32> -> vector<16x128xf32>
    %104 = arith.addf %98, %103 : vector<16x128xf32>
    %c1_108 = arith.constant 1 : index
    %c0_109 = arith.constant 0 : index
    %105 = vector.load %arg9[%c1_108, %c0_109] : memref<18x128xf32, #tpu.memory_space<vmem>>, vector<16x128xf32>
    %106 = arith.truncf %105 : vector<16x128xf32> to vector<16x128xbf16>
    %c2_110 = arith.constant 2 : index
    %c1_111 = arith.constant 1 : index
    %c0_112 = arith.constant 0 : index
    %c0_113 = arith.constant 0 : index
    %107 = vector.load %arg3[%c2_110, %c1_111, %c0_112, %c0_113] : memref<8x3x128x128xbf16, #tpu.memory_space<vmem>>, vector<1x1x128x128xbf16>
    %108 = vector.shape_cast %107 : vector<1x1x128x128xbf16> to vector<128x128xbf16>
    %cst_114 = arith.constant dense<0.000000e+00> : vector<16x128xf32>
    %109 = tpu.matmul %106, %108, %cst_114 {dimension_numbers = #tpu.dot_dimension_numbers<[1], [0], [0], [1], [0, 0, 1, 1], [], []>} : vector<16x128xbf16>, vector<128x128xbf16>, vector<16x128xf32> -> vector<16x128xf32>
    %110 = arith.addf %104, %109 : vector<16x128xf32>
    %c2_115 = arith.constant 2 : index
    %c0_116 = arith.constant 0 : index
    %111 = vector.load %arg9[%c2_115, %c0_116] : memref<18x128xf32, #tpu.memory_space<vmem>>, vector<16x128xf32>
    %112 = arith.truncf %111 : vector<16x128xf32> to vector<16x128xbf16>
    %c2_117 = arith.constant 2 : index
    %c2_118 = arith.constant 2 : index
    %c0_119 = arith.constant 0 : index
    %c0_120 = arith.constant 0 : index
    %113 = vector.load %arg3[%c2_117, %c2_118, %c0_119, %c0_120] : memref<8x3x128x128xbf16, #tpu.memory_space<vmem>>, vector<1x1x128x128xbf16>
    %114 = vector.shape_cast %113 : vector<1x1x128x128xbf16> to vector<128x128xbf16>
    %cst_121 = arith.constant dense<0.000000e+00> : vector<16x128xf32>
    %115 = tpu.matmul %112, %114, %cst_121 {dimension_numbers = #tpu.dot_dimension_numbers<[1], [0], [0], [1], [0, 0, 1, 1], [], []>} : vector<16x128xbf16>, vector<128x128xbf16>, vector<16x128xf32> -> vector<16x128xf32>
    %116 = arith.addf %110, %115 : vector<16x128xf32>
    %c3_122 = arith.constant 3 : index
    %c0_123 = arith.constant 0 : index
    %117 = vector.load %arg5[%c3_122, %c0_123] : memref<10x128xf32, #tpu.memory_space<vmem>>, vector<1x128xf32>
    %118 = vector.broadcast %117 : vector<1x128xf32> to vector<16x128xf32>
    %119 = arith.addf %116, %118 : vector<16x128xf32>
    %cst_124 = arith.constant 0.000000e+00 : f32
    %120 = vector.broadcast %cst_124 : f32 to vector<16x128xf32>
    %121 = arith.cmpf oge, %119, %120 : vector<16x128xf32>
    %c1_125 = arith.constant 1 : index
    %c0_126 = arith.constant 0 : index
    %122 = vector.load %arg6[%c1_125, %c0_126] : memref<4x128xf32, #tpu.memory_space<vmem>>, vector<1x128xf32>
    %123 = vector.broadcast %122 : vector<1x128xf32> to vector<16x128xf32>
    %124 = arith.mulf %123, %119 : vector<16x128xf32>
    %125 = arith.select %121, %119, %124 : vector<16x128xi1>, vector<16x128xf32>
    %c1_127 = arith.constant 1 : index
    %c0_128 = arith.constant 0 : index
    %126 = vector.load %arg10[%c1_127, %c0_128] : memref<18x128xf32, #tpu.memory_space<vmem>>, vector<16x128xf32>
    tpu.vector_store %arg10[%c1_127, %c0_128], %125 {strides = array<i32>} : memref<18x128xf32, #tpu.memory_space<vmem>>, vector<16x128xf32>,
    %cst_129 = arith.constant 0.000000e+00 : f32
    %127 = vector.broadcast %cst_129 : f32 to vector<16x128xf32>
    %c0_130 = arith.constant 0 : index
    %c0_131 = arith.constant 0 : index
    %128 = vector.load %arg10[%c0_130, %c0_131] : memref<18x128xf32, #tpu.memory_space<vmem>>, vector<16x128xf32>
    %129 = arith.truncf %128 : vector<16x128xf32> to vector<16x128xbf16>
    %c3_132 = arith.constant 3 : index
    %c0_133 = arith.constant 0 : index
    %c0_134 = arith.constant 0 : index
    %c0_135 = arith.constant 0 : index
    %130 = vector.load %arg3[%c3_132, %c0_133, %c0_134, %c0_135] : memref<8x3x128x128xbf16, #tpu.memory_space<vmem>>, vector<1x1x128x128xbf16>
    %131 = vector.shape_cast %130 : vector<1x1x128x128xbf16> to vector<128x128xbf16>
    %cst_136 = arith.constant dense<0.000000e+00> : vector<16x128xf32>
    %132 = tpu.matmul %129, %131, %cst_136 {dimension_numbers = #tpu.dot_dimension_numbers<[1], [0], [0], [1], [0, 0, 1, 1], [], []>} : vector<16x128xbf16>, vector<128x128xbf16>, vector<16x128xf32> -> vector<16x128xf32>
    %133 = arith.addf %127, %132 : vector<16x128xf32>
    %c1_137 = arith.constant 1 : index
    %c0_138 = arith.constant 0 : index
    %134 = vector.load %arg10[%c1_137, %c0_138] : memref<18x128xf32, #tpu.memory_space<vmem>>, vector<16x128xf32>
    %135 = arith.truncf %134 : vector<16x128xf32> to vector<16x128xbf16>
    %c3_139 = arith.constant 3 : index
    %c1_140 = arith.constant 1 : index
    %c0_141 = arith.constant 0 : index
    %c0_142 = arith.constant 0 : index
    %136 = vector.load %arg3[%c3_139, %c1_140, %c0_141, %c0_142] : memref<8x3x128x128xbf16, #tpu.memory_space<vmem>>, vector<1x1x128x128xbf16>
    %137 = vector.shape_cast %136 : vector<1x1x128x128xbf16> to vector<128x128xbf16>
    %cst_143 = arith.constant dense<0.000000e+00> : vector<16x128xf32>
    %138 = tpu.matmul %135, %137, %cst_143 {dimension_numbers = #tpu.dot_dimension_numbers<[1], [0], [0], [1], [0, 0, 1, 1], [], []>} : vector<16x128xbf16>, vector<128x128xbf16>, vector<16x128xf32> -> vector<16x128xf32>
    %139 = arith.addf %133, %138 : vector<16x128xf32>
    %c2_144 = arith.constant 2 : index
    %c0_145 = arith.constant 0 : index
    %140 = vector.load %arg10[%c2_144, %c0_145] : memref<18x128xf32, #tpu.memory_space<vmem>>, vector<16x128xf32>
    %141 = arith.truncf %140 : vector<16x128xf32> to vector<16x128xbf16>
    %c3_146 = arith.constant 3 : index
    %c2_147 = arith.constant 2 : index
    %c0_148 = arith.constant 0 : index
    %c0_149 = arith.constant 0 : index
    %142 = vector.load %arg3[%c3_146, %c2_147, %c0_148, %c0_149] : memref<8x3x128x128xbf16, #tpu.memory_space<vmem>>, vector<1x1x128x128xbf16>
    %143 = vector.shape_cast %142 : vector<1x1x128x128xbf16> to vector<128x128xbf16>
    %cst_150 = arith.constant dense<0.000000e+00> : vector<16x128xf32>
    %144 = tpu.matmul %141, %143, %cst_150 {dimension_numbers = #tpu.dot_dimension_numbers<[1], [0], [0], [1], [0, 0, 1, 1], [], []>} : vector<16x128xbf16>, vector<128x128xbf16>, vector<16x128xf32> -> vector<16x128xf32>
    %145 = arith.addf %139, %144 : vector<16x128xf32>
    %c4_151 = arith.constant 4 : index
    %c0_152 = arith.constant 0 : index
    %146 = vector.load %arg5[%c4_151, %c0_152] : memref<10x128xf32, #tpu.memory_space<vmem>>, vector<1x128xf32>
    %147 = vector.broadcast %146 : vector<1x128xf32> to vector<16x128xf32>
    %148 = arith.addf %145, %147 : vector<16x128xf32>
    %c1_153 = arith.constant 1 : index
    %c0_154 = arith.constant 0 : index
    %149 = vector.load %arg9[%c1_153, %c0_154] : memref<18x128xf32, #tpu.memory_space<vmem>>, vector<16x128xf32>
    %150 = arith.addf %149, %148 : vector<16x128xf32>
    %c1_155 = arith.constant 1 : index
    %c0_156 = arith.constant 0 : index
    %151 = vector.load %arg9[%c1_155, %c0_156] : memref<18x128xf32, #tpu.memory_space<vmem>>, vector<16x128xf32>
    tpu.vector_store %arg9[%c1_155, %c0_156], %150 {strides = array<i32>} : memref<18x128xf32, #tpu.memory_space<vmem>>, vector<16x128xf32>,
    %cst_157 = arith.constant 0.000000e+00 : f32
    %152 = vector.broadcast %cst_157 : f32 to vector<16x128xf32>
    %c0_158 = arith.constant 0 : index
    %c0_159 = arith.constant 0 : index
    %153 = vector.load %arg9[%c0_158, %c0_159] : memref<18x128xf32, #tpu.memory_space<vmem>>, vector<16x128xf32>
    %154 = arith.truncf %153 : vector<16x128xf32> to vector<16x128xbf16>
    %c4_160 = arith.constant 4 : index
    %c0_161 = arith.constant 0 : index
    %c0_162 = arith.constant 0 : index
    %c0_163 = arith.constant 0 : index
    %155 = vector.load %arg3[%c4_160, %c0_161, %c0_162, %c0_163] : memref<8x3x128x128xbf16, #tpu.memory_space<vmem>>, vector<1x1x128x128xbf16>
    %156 = vector.shape_cast %155 : vector<1x1x128x128xbf16> to vector<128x128xbf16>
    %cst_164 = arith.constant dense<0.000000e+00> : vector<16x128xf32>
    %157 = tpu.matmul %154, %156, %cst_164 {dimension_numbers = #tpu.dot_dimension_numbers<[1], [0], [0], [1], [0, 0, 1, 1], [], []>} : vector<16x128xbf16>, vector<128x128xbf16>, vector<16x128xf32> -> vector<16x128xf32>
    %158 = arith.addf %152, %157 : vector<16x128xf32>
    %c1_165 = arith.constant 1 : index
    %c0_166 = arith.constant 0 : index
    %159 = vector.load %arg9[%c1_165, %c0_166] : memref<18x128xf32, #tpu.memory_space<vmem>>, vector<16x128xf32>
    %160 = arith.truncf %159 : vector<16x128xf32> to vector<16x128xbf16>
    %c4_167 = arith.constant 4 : index
    %c1_168 = arith.constant 1 : index
    %c0_169 = arith.constant 0 : index
    %c0_170 = arith.constant 0 : index
    %161 = vector.load %arg3[%c4_167, %c1_168, %c0_169, %c0_170] : memref<8x3x128x128xbf16, #tpu.memory_space<vmem>>, vector<1x1x128x128xbf16>
    %162 = vector.shape_cast %161 : vector<1x1x128x128xbf16> to vector<128x128xbf16>
    %cst_171 = arith.constant dense<0.000000e+00> : vector<16x128xf32>
    %163 = tpu.matmul %160, %162, %cst_171 {dimension_numbers = #tpu.dot_dimension_numbers<[1], [0], [0], [1], [0, 0, 1, 1], [], []>} : vector<16x128xbf16>, vector<128x128xbf16>, vector<16x128xf32> -> vector<16x128xf32>
    %164 = arith.addf %158, %163 : vector<16x128xf32>
    %c2_172 = arith.constant 2 : index
    %c0_173 = arith.constant 0 : index
    %165 = vector.load %arg9[%c2_172, %c0_173] : memref<18x128xf32, #tpu.memory_space<vmem>>, vector<16x128xf32>
    %166 = arith.truncf %165 : vector<16x128xf32> to vector<16x128xbf16>
    %c4_174 = arith.constant 4 : index
    %c2_175 = arith.constant 2 : index
    %c0_176 = arith.constant 0 : index
    %c0_177 = arith.constant 0 : index
    %167 = vector.load %arg3[%c4_174, %c2_175, %c0_176, %c0_177] : memref<8x3x128x128xbf16, #tpu.memory_space<vmem>>, vector<1x1x128x128xbf16>
    %168 = vector.shape_cast %167 : vector<1x1x128x128xbf16> to vector<128x128xbf16>
    %cst_178 = arith.constant dense<0.000000e+00> : vector<16x128xf32>
    %169 = tpu.matmul %166, %168, %cst_178 {dimension_numbers = #tpu.dot_dimension_numbers<[1], [0], [0], [1], [0, 0, 1, 1], [], []>} : vector<16x128xbf16>, vector<128x128xbf16>, vector<16x128xf32> -> vector<16x128xf32>
    %170 = arith.addf %164, %169 : vector<16x128xf32>
    %c5 = arith.constant 5 : index
    %c0_179 = arith.constant 0 : index
    %171 = vector.load %arg5[%c5, %c0_179] : memref<10x128xf32, #tpu.memory_space<vmem>>, vector<1x128xf32>
    %172 = vector.broadcast %171 : vector<1x128xf32> to vector<16x128xf32>
    %173 = arith.addf %170, %172 : vector<16x128xf32>
    %cst_180 = arith.constant 0.000000e+00 : f32
    %174 = vector.broadcast %cst_180 : f32 to vector<16x128xf32>
    %175 = arith.cmpf oge, %173, %174 : vector<16x128xf32>
    %c2_181 = arith.constant 2 : index
    %c0_182 = arith.constant 0 : index
    %176 = vector.load %arg6[%c2_181, %c0_182] : memref<4x128xf32, #tpu.memory_space<vmem>>, vector<1x128xf32>
    %177 = vector.broadcast %176 : vector<1x128xf32> to vector<16x128xf32>
    %178 = arith.mulf %177, %173 : vector<16x128xf32>
    %179 = arith.select %175, %173, %178 : vector<16x128xi1>, vector<16x128xf32>
    %c1_183 = arith.constant 1 : index
    %c0_184 = arith.constant 0 : index
    %180 = vector.load %arg10[%c1_183, %c0_184] : memref<18x128xf32, #tpu.memory_space<vmem>>, vector<16x128xf32>
    tpu.vector_store %arg10[%c1_183, %c0_184], %179 {strides = array<i32>} : memref<18x128xf32, #tpu.memory_space<vmem>>, vector<16x128xf32>,
    %cst_185 = arith.constant 0.000000e+00 : f32
    %181 = vector.broadcast %cst_185 : f32 to vector<16x128xf32>
    %c0_186 = arith.constant 0 : index
    %c0_187 = arith.constant 0 : index
    %182 = vector.load %arg10[%c0_186, %c0_187] : memref<18x128xf32, #tpu.memory_space<vmem>>, vector<16x128xf32>
    %183 = arith.truncf %182 : vector<16x128xf32> to vector<16x128xbf16>
    %c5_188 = arith.constant 5 : index
    %c0_189 = arith.constant 0 : index
    %c0_190 = arith.constant 0 : index
    %c0_191 = arith.constant 0 : index
    %184 = vector.load %arg3[%c5_188, %c0_189, %c0_190, %c0_191] : memref<8x3x128x128xbf16, #tpu.memory_space<vmem>>, vector<1x1x128x128xbf16>
    %185 = vector.shape_cast %184 : vector<1x1x128x128xbf16> to vector<128x128xbf16>
    %cst_192 = arith.constant dense<0.000000e+00> : vector<16x128xf32>
    %186 = tpu.matmul %183, %185, %cst_192 {dimension_numbers = #tpu.dot_dimension_numbers<[1], [0], [0], [1], [0, 0, 1, 1], [], []>} : vector<16x128xbf16>, vector<128x128xbf16>, vector<16x128xf32> -> vector<16x128xf32>
    %187 = arith.addf %181, %186 : vector<16x128xf32>
    %c1_193 = arith.constant 1 : index
    %c0_194 = arith.constant 0 : index
    %188 = vector.load %arg10[%c1_193, %c0_194] : memref<18x128xf32, #tpu.memory_space<vmem>>, vector<16x128xf32>
    %189 = arith.truncf %188 : vector<16x128xf32> to vector<16x128xbf16>
    %c5_195 = arith.constant 5 : index
    %c1_196 = arith.constant 1 : index
    %c0_197 = arith.constant 0 : index
    %c0_198 = arith.constant 0 : index
    %190 = vector.load %arg3[%c5_195, %c1_196, %c0_197, %c0_198] : memref<8x3x128x128xbf16, #tpu.memory_space<vmem>>, vector<1x1x128x128xbf16>
    %191 = vector.shape_cast %190 : vector<1x1x128x128xbf16> to vector<128x128xbf16>
    %cst_199 = arith.constant dense<0.000000e+00> : vector<16x128xf32>
    %192 = tpu.matmul %189, %191, %cst_199 {dimension_numbers = #tpu.dot_dimension_numbers<[1], [0], [0], [1], [0, 0, 1, 1], [], []>} : vector<16x128xbf16>, vector<128x128xbf16>, vector<16x128xf32> -> vector<16x128xf32>
    %193 = arith.addf %187, %192 : vector<16x128xf32>
    %c2_200 = arith.constant 2 : index
    %c0_201 = arith.constant 0 : index
    %194 = vector.load %arg10[%c2_200, %c0_201] : memref<18x128xf32, #tpu.memory_space<vmem>>, vector<16x128xf32>
    %195 = arith.truncf %194 : vector<16x128xf32> to vector<16x128xbf16>
    %c5_202 = arith.constant 5 : index
    %c2_203 = arith.constant 2 : index
    %c0_204 = arith.constant 0 : index
    %c0_205 = arith.constant 0 : index
    %196 = vector.load %arg3[%c5_202, %c2_203, %c0_204, %c0_205] : memref<8x3x128x128xbf16, #tpu.memory_space<vmem>>, vector<1x1x128x128xbf16>
    %197 = vector.shape_cast %196 : vector<1x1x128x128xbf16> to vector<128x128xbf16>
    %cst_206 = arith.constant dense<0.000000e+00> : vector<16x128xf32>
    %198 = tpu.matmul %195, %197, %cst_206 {dimension_numbers = #tpu.dot_dimension_numbers<[1], [0], [0], [1], [0, 0, 1, 1], [], []>} : vector<16x128xbf16>, vector<128x128xbf16>, vector<16x128xf32> -> vector<16x128xf32>
    %199 = arith.addf %193, %198 : vector<16x128xf32>
    %c6 = arith.constant 6 : index
    %c0_207 = arith.constant 0 : index
    %200 = vector.load %arg5[%c6, %c0_207] : memref<10x128xf32, #tpu.memory_space<vmem>>, vector<1x128xf32>
    %201 = vector.broadcast %200 : vector<1x128xf32> to vector<16x128xf32>
    %202 = arith.addf %199, %201 : vector<16x128xf32>
    %c1_208 = arith.constant 1 : index
    %c0_209 = arith.constant 0 : index
    %203 = vector.load %arg9[%c1_208, %c0_209] : memref<18x128xf32, #tpu.memory_space<vmem>>, vector<16x128xf32>
    %204 = arith.addf %203, %202 : vector<16x128xf32>
    %c1_210 = arith.constant 1 : index
    %c0_211 = arith.constant 0 : index
    %205 = vector.load %arg9[%c1_210, %c0_211] : memref<18x128xf32, #tpu.memory_space<vmem>>, vector<16x128xf32>
    tpu.vector_store %arg9[%c1_210, %c0_211], %204 {strides = array<i32>} : memref<18x128xf32, #tpu.memory_space<vmem>>, vector<16x128xf32>,
    %cst_212 = arith.constant 0.000000e+00 : f32
    %206 = vector.broadcast %cst_212 : f32 to vector<16x128xf32>
    %c0_213 = arith.constant 0 : index
    %c0_214 = arith.constant 0 : index
    %207 = vector.load %arg9[%c0_213, %c0_214] : memref<18x128xf32, #tpu.memory_space<vmem>>, vector<16x128xf32>
    %208 = arith.truncf %207 : vector<16x128xf32> to vector<16x128xbf16>
    %c6_215 = arith.constant 6 : index
    %c0_216 = arith.constant 0 : index
    %c0_217 = arith.constant 0 : index
    %c0_218 = arith.constant 0 : index
    %209 = vector.load %arg3[%c6_215, %c0_216, %c0_217, %c0_218] : memref<8x3x128x128xbf16, #tpu.memory_space<vmem>>, vector<1x1x128x128xbf16>
    %210 = vector.shape_cast %209 : vector<1x1x128x128xbf16> to vector<128x128xbf16>
    %cst_219 = arith.constant dense<0.000000e+00> : vector<16x128xf32>
    %211 = tpu.matmul %208, %210, %cst_219 {dimension_numbers = #tpu.dot_dimension_numbers<[1], [0], [0], [1], [0, 0, 1, 1], [], []>} : vector<16x128xbf16>, vector<128x128xbf16>, vector<16x128xf32> -> vector<16x128xf32>
    %212 = arith.addf %206, %211 : vector<16x128xf32>
    %c1_220 = arith.constant 1 : index
    %c0_221 = arith.constant 0 : index
    %213 = vector.load %arg9[%c1_220, %c0_221] : memref<18x128xf32, #tpu.memory_space<vmem>>, vector<16x128xf32>
    %214 = arith.truncf %213 : vector<16x128xf32> to vector<16x128xbf16>
    %c6_222 = arith.constant 6 : index
    %c1_223 = arith.constant 1 : index
    %c0_224 = arith.constant 0 : index
    %c0_225 = arith.constant 0 : index
    %215 = vector.load %arg3[%c6_222, %c1_223, %c0_224, %c0_225] : memref<8x3x128x128xbf16, #tpu.memory_space<vmem>>, vector<1x1x128x128xbf16>
    %216 = vector.shape_cast %215 : vector<1x1x128x128xbf16> to vector<128x128xbf16>
    %cst_226 = arith.constant dense<0.000000e+00> : vector<16x128xf32>
    %217 = tpu.matmul %214, %216, %cst_226 {dimension_numbers = #tpu.dot_dimension_numbers<[1], [0], [0], [1], [0, 0, 1, 1], [], []>} : vector<16x128xbf16>, vector<128x128xbf16>, vector<16x128xf32> -> vector<16x128xf32>
    %218 = arith.addf %212, %217 : vector<16x128xf32>
    %c2_227 = arith.constant 2 : index
    %c0_228 = arith.constant 0 : index
    %219 = vector.load %arg9[%c2_227, %c0_228] : memref<18x128xf32, #tpu.memory_space<vmem>>, vector<16x128xf32>
    %220 = arith.truncf %219 : vector<16x128xf32> to vector<16x128xbf16>
    %c6_229 = arith.constant 6 : index
    %c2_230 = arith.constant 2 : index
    %c0_231 = arith.constant 0 : index
    %c0_232 = arith.constant 0 : index
    %221 = vector.load %arg3[%c6_229, %c2_230, %c0_231, %c0_232] : memref<8x3x128x128xbf16, #tpu.memory_space<vmem>>, vector<1x1x128x128xbf16>
    %222 = vector.shape_cast %221 : vector<1x1x128x128xbf16> to vector<128x128xbf16>
    %cst_233 = arith.constant dense<0.000000e+00> : vector<16x128xf32>
    %223 = tpu.matmul %220, %222, %cst_233 {dimension_numbers = #tpu.dot_dimension_numbers<[1], [0], [0], [1], [0, 0, 1, 1], [], []>} : vector<16x128xbf16>, vector<128x128xbf16>, vector<16x128xf32> -> vector<16x128xf32>
    %224 = arith.addf %218, %223 : vector<16x128xf32>
    %c7 = arith.constant 7 : index
    %c0_234 = arith.constant 0 : index
    %225 = vector.load %arg5[%c7, %c0_234] : memref<10x128xf32, #tpu.memory_space<vmem>>, vector<1x128xf32>
    %226 = vector.broadcast %225 : vector<1x128xf32> to vector<16x128xf32>
    %227 = arith.addf %224, %226 : vector<16x128xf32>
    %cst_235 = arith.constant 0.000000e+00 : f32
    %228 = vector.broadcast %cst_235 : f32 to vector<16x128xf32>
    %229 = arith.cmpf oge, %227, %228 : vector<16x128xf32>
    %c3_236 = arith.constant 3 : index
    %c0_237 = arith.constant 0 : index
    %230 = vector.load %arg6[%c3_236, %c0_237] : memref<4x128xf32, #tpu.memory_space<vmem>>, vector<1x128xf32>
    %231 = vector.broadcast %230 : vector<1x128xf32> to vector<16x128xf32>
    %232 = arith.mulf %231, %227 : vector<16x128xf32>
    %233 = arith.select %229, %227, %232 : vector<16x128xi1>, vector<16x128xf32>
    %c1_238 = arith.constant 1 : index
    %c0_239 = arith.constant 0 : index
    %234 = vector.load %arg10[%c1_238, %c0_239] : memref<18x128xf32, #tpu.memory_space<vmem>>, vector<16x128xf32>
    tpu.vector_store %arg10[%c1_238, %c0_239], %233 {strides = array<i32>} : memref<18x128xf32, #tpu.memory_space<vmem>>, vector<16x128xf32>,
    %cst_240 = arith.constant 0.000000e+00 : f32
    %235 = vector.broadcast %cst_240 : f32 to vector<16x128xf32>
    %c0_241 = arith.constant 0 : index
    %c0_242 = arith.constant 0 : index
    %236 = vector.load %arg10[%c0_241, %c0_242] : memref<18x128xf32, #tpu.memory_space<vmem>>, vector<16x128xf32>
    %237 = arith.truncf %236 : vector<16x128xf32> to vector<16x128xbf16>
    %c7_243 = arith.constant 7 : index
    %c0_244 = arith.constant 0 : index
    %c0_245 = arith.constant 0 : index
    %c0_246 = arith.constant 0 : index
    %238 = vector.load %arg3[%c7_243, %c0_244, %c0_245, %c0_246] : memref<8x3x128x128xbf16, #tpu.memory_space<vmem>>, vector<1x1x128x128xbf16>
    %239 = vector.shape_cast %238 : vector<1x1x128x128xbf16> to vector<128x128xbf16>
    %cst_247 = arith.constant dense<0.000000e+00> : vector<16x128xf32>
    %240 = tpu.matmul %237, %239, %cst_247 {dimension_numbers = #tpu.dot_dimension_numbers<[1], [0], [0], [1], [0, 0, 1, 1], [], []>} : vector<16x128xbf16>, vector<128x128xbf16>, vector<16x128xf32> -> vector<16x128xf32>
    %241 = arith.addf %235, %240 : vector<16x128xf32>
    %c1_248 = arith.constant 1 : index
    %c0_249 = arith.constant 0 : index
    %242 = vector.load %arg10[%c1_248, %c0_249] : memref<18x128xf32, #tpu.memory_space<vmem>>, vector<16x128xf32>
    %243 = arith.truncf %242 : vector<16x128xf32> to vector<16x128xbf16>
    %c7_250 = arith.constant 7 : index
    %c1_251 = arith.constant 1 : index
    %c0_252 = arith.constant 0 : index
    %c0_253 = arith.constant 0 : index
    %244 = vector.load %arg3[%c7_250, %c1_251, %c0_252, %c0_253] : memref<8x3x128x128xbf16, #tpu.memory_space<vmem>>, vector<1x1x128x128xbf16>
    %245 = vector.shape_cast %244 : vector<1x1x128x128xbf16> to vector<128x128xbf16>
    %cst_254 = arith.constant dense<0.000000e+00> : vector<16x128xf32>
    %246 = tpu.matmul %243, %245, %cst_254 {dimension_numbers = #tpu.dot_dimension_numbers<[1], [0], [0], [1], [0, 0, 1, 1], [], []>} : vector<16x128xbf16>, vector<128x128xbf16>, vector<16x128xf32> -> vector<16x128xf32>
    %247 = arith.addf %241, %246 : vector<16x128xf32>
    %c2_255 = arith.constant 2 : index
    %c0_256 = arith.constant 0 : index
    %248 = vector.load %arg10[%c2_255, %c0_256] : memref<18x128xf32, #tpu.memory_space<vmem>>, vector<16x128xf32>
    %249 = arith.truncf %248 : vector<16x128xf32> to vector<16x128xbf16>
    %c7_257 = arith.constant 7 : index
    %c2_258 = arith.constant 2 : index
    %c0_259 = arith.constant 0 : index
    %c0_260 = arith.constant 0 : index
    %250 = vector.load %arg3[%c7_257, %c2_258, %c0_259, %c0_260] : memref<8x3x128x128xbf16, #tpu.memory_space<vmem>>, vector<1x1x128x128xbf16>
    %251 = vector.shape_cast %250 : vector<1x1x128x128xbf16> to vector<128x128xbf16>
    %cst_261 = arith.constant dense<0.000000e+00> : vector<16x128xf32>
    %252 = tpu.matmul %249, %251, %cst_261 {dimension_numbers = #tpu.dot_dimension_numbers<[1], [0], [0], [1], [0, 0, 1, 1], [], []>} : vector<16x128xbf16>, vector<128x128xbf16>, vector<16x128xf32> -> vector<16x128xf32>
    %253 = arith.addf %247, %252 : vector<16x128xf32>
    %c8 = arith.constant 8 : index
    %c0_262 = arith.constant 0 : index
    %254 = vector.load %arg5[%c8, %c0_262] : memref<10x128xf32, #tpu.memory_space<vmem>>, vector<1x128xf32>
    %255 = vector.broadcast %254 : vector<1x128xf32> to vector<16x128xf32>
    %256 = arith.addf %253, %255 : vector<16x128xf32>
    %c1_263 = arith.constant 1 : index
    %c0_264 = arith.constant 0 : index
    %257 = vector.load %arg9[%c1_263, %c0_264] : memref<18x128xf32, #tpu.memory_space<vmem>>, vector<16x128xf32>
    %258 = arith.addf %257, %256 : vector<16x128xf32>
    %c1_265 = arith.constant 1 : index
    %c0_266 = arith.constant 0 : index
    %259 = vector.load %arg9[%c1_265, %c0_266] : memref<18x128xf32, #tpu.memory_space<vmem>>, vector<16x128xf32>
    tpu.vector_store %arg9[%c1_265, %c0_266], %258 {strides = array<i32>} : memref<18x128xf32, #tpu.memory_space<vmem>>, vector<16x128xf32>,
    %cst_267 = arith.constant 0.000000e+00 : f32
    %260 = vector.broadcast %cst_267 : f32 to vector<16x16xf32>
    %c0_268 = arith.constant 0 : index
    %c0_269 = arith.constant 0 : index
    %261 = vector.load %arg9[%c0_268, %c0_269] : memref<18x128xf32, #tpu.memory_space<vmem>>, vector<16x128xf32>
    %262 = arith.truncf %261 : vector<16x128xf32> to vector<16x128xbf16>
    %c0_270 = arith.constant 0 : index
    %c0_271 = arith.constant 0 : index
    %c0_272 = arith.constant 0 : index
    %263 = vector.load %arg4[%c0_270, %c0_271, %c0_272] : memref<3x128x16xbf16, #tpu.memory_space<vmem>>, vector<1x128x16xbf16>
    %264 = vector.shape_cast %263 : vector<1x128x16xbf16> to vector<128x16xbf16>
    %cst_273 = arith.constant dense<0.000000e+00> : vector<16x16xf32>
    %265 = tpu.matmul %262, %264, %cst_273 {dimension_numbers = #tpu.dot_dimension_numbers<[1], [0], [0], [1], [0, 0, 1, 1], [], []>} : vector<16x128xbf16>, vector<128x16xbf16>, vector<16x16xf32> -> vector<16x16xf32>
    %266 = arith.addf %260, %265 : vector<16x16xf32>
    %c1_274 = arith.constant 1 : index
    %c0_275 = arith.constant 0 : index
    %267 = vector.load %arg9[%c1_274, %c0_275] : memref<18x128xf32, #tpu.memory_space<vmem>>, vector<16x128xf32>
    %268 = arith.truncf %267 : vector<16x128xf32> to vector<16x128xbf16>
    %c1_276 = arith.constant 1 : index
    %c0_277 = arith.constant 0 : index
    %c0_278 = arith.constant 0 : index
    %269 = vector.load %arg4[%c1_276, %c0_277, %c0_278] : memref<3x128x16xbf16, #tpu.memory_space<vmem>>, vector<1x128x16xbf16>
    %270 = vector.shape_cast %269 : vector<1x128x16xbf16> to vector<128x16xbf16>
    %cst_279 = arith.constant dense<0.000000e+00> : vector<16x16xf32>
    %271 = tpu.matmul %268, %270, %cst_279 {dimension_numbers = #tpu.dot_dimension_numbers<[1], [0], [0], [1], [0, 0, 1, 1], [], []>} : vector<16x128xbf16>, vector<128x16xbf16>, vector<16x16xf32> -> vector<16x16xf32>
    %272 = arith.addf %266, %271 : vector<16x16xf32>
    %c2_280 = arith.constant 2 : index
    %c0_281 = arith.constant 0 : index
    %273 = vector.load %arg9[%c2_280, %c0_281] : memref<18x128xf32, #tpu.memory_space<vmem>>, vector<16x128xf32>
    %274 = arith.truncf %273 : vector<16x128xf32> to vector<16x128xbf16>
    %c2_282 = arith.constant 2 : index
    %c0_283 = arith.constant 0 : index
    %c0_284 = arith.constant 0 : index
    %275 = vector.load %arg4[%c2_282, %c0_283, %c0_284] : memref<3x128x16xbf16, #tpu.memory_space<vmem>>, vector<1x128x16xbf16>
    %276 = vector.shape_cast %275 : vector<1x128x16xbf16> to vector<128x16xbf16>
    %cst_285 = arith.constant dense<0.000000e+00> : vector<16x16xf32>
    %277 = tpu.matmul %274, %276, %cst_285 {dimension_numbers = #tpu.dot_dimension_numbers<[1], [0], [0], [1], [0, 0, 1, 1], [], []>} : vector<16x128xbf16>, vector<128x16xbf16>, vector<16x16xf32> -> vector<16x16xf32>
    %278 = arith.addf %272, %277 : vector<16x16xf32>
    %c9 = arith.constant 9 : index
    %c0_286 = arith.constant 0 : index
    %279 = vector.load %arg5[%c9, %c0_286] : memref<10x128xf32, #tpu.memory_space<vmem>>, vector<1x16xf32>
    %280 = vector.broadcast %279 : vector<1x16xf32> to vector<16x16xf32>
    %281 = arith.addf %278, %280 : vector<16x16xf32>
    %c0_287 = arith.constant 0 : index
    %c0_288 = arith.constant 0 : index
    %c0_289 = arith.constant 0 : index
    %282 = vector.load %arg7[%c0_287, %c0_288, %c0_289] : memref<1x16x16xf32, #tpu.memory_space<vmem>>, vector<1x16x16xf32>
    %283 = vector.shape_cast %282 : vector<1x16x16xf32> to vector<16x16xf32>
    %284 = vector.shape_cast %281 : vector<16x16xf32> to vector<1x16x16xf32>
    tpu.vector_store %arg7[%c0_287, %c0_288, %c0_289], %284 {strides = array<i32>} : memref<1x16x16xf32, #tpu.memory_space<vmem>>, vector<1x16x16xf32>,
    return
  }
  func.func @transform_0(%arg0: i32) -> (i32, i32, i32) {
    %c0_i32 = arith.constant 0 : i32
    %c0_i32_0 = arith.constant 0 : i32
    %c0_i32_1 = arith.constant 0 : i32
    return %arg0, %c0_i32, %c0_i32_0 : i32, i32, i32
  }
  func.func @transform_1(%arg0: i32) -> (i32, i32, i32) {
    %c0_i32 = arith.constant 0 : i32
    %c0_i32_0 = arith.constant 0 : i32
    %c0_i32_1 = arith.constant 0 : i32
    %c0_i32_2 = arith.constant 0 : i32
    return %c0_i32, %c0_i32_0, %c0_i32_1 : i32, i32, i32
  }
  func.func @transform_2(%arg0: i32) -> (i32, i32, i32, i32) {
    %c0_i32 = arith.constant 0 : i32
    %c0_i32_0 = arith.constant 0 : i32
    %c0_i32_1 = arith.constant 0 : i32
    %c0_i32_2 = arith.constant 0 : i32
    %c0_i32_3 = arith.constant 0 : i32
    return %c0_i32, %c0_i32_0, %c0_i32_1, %c0_i32_2 : i32, i32, i32, i32
  }
  func.func @transform_3(%arg0: i32) -> (i32, i32, i32) {
    %c0_i32 = arith.constant 0 : i32
    %c0_i32_0 = arith.constant 0 : i32
    %c0_i32_1 = arith.constant 0 : i32
    %c0_i32_2 = arith.constant 0 : i32
    return %c0_i32, %c0_i32_0, %c0_i32_1 : i32, i32, i32
  }
  func.func @transform_4(%arg0: i32) -> (i32, i32) {
    %c0_i32 = arith.constant 0 : i32
    %c0_i32_0 = arith.constant 0 : i32
    %c0_i32_1 = arith.constant 0 : i32
    return %c0_i32, %c0_i32_0 : i32, i32
  }
  func.func @transform_5(%arg0: i32) -> (i32, i32) {
    %c0_i32 = arith.constant 0 : i32
    %c0_i32_0 = arith.constant 0 : i32
    %c0_i32_1 = arith.constant 0 : i32
    return %c0_i32, %c0_i32_0 : i32, i32
  }
  func.func @transform_6(%arg0: i32) -> (i32, i32, i32) {
    %c0_i32 = arith.constant 0 : i32
    %c0_i32_0 = arith.constant 0 : i32
    %c0_i32_1 = arith.constant 0 : i32
    return %arg0, %c0_i32, %c0_i32_0 : i32, i32, i32
  }
}

</mosaic_0001>

<bundles_post_ra>
// kernel: tile.68
= control target key start
LH: loop header
LB: loop body
LE: loop exit
PB: predicated region body
PF: predicated region fallthrough
CT: control target
= control target key end

     0   :  { %s28_s0 = inlined_call_operand.vmem [shape: f32[8], index: 0, kind: input, shape index: {}]   ;;  %s29_s1 = inlined_call_operand.vmem [shape: f32[16,8], index: 1, kind: output, shape index: {}]  }
   0x1   :  { %v4_v0 = vld [vmem:[%s28_s0] ss:$0 sm:$0xff] }
   0x2   :  { %5 = vst [vmem:[%s29_s1] sm:$0xff] %v4_v0  ;;  %8 = vst [vmem:[%s29_s1 + $0x8] sm:$0xff] %v4_v0 }

// kernel: tile.101
= control target key start
LH: loop header
LB: loop body
LE: loop exit
PB: predicated region body
PF: predicated region fallthrough
CT: control target
= control target key end

     0   :  { %s133_s10 = smov 120   ;;  %s134_s11 = smov 104   ;;  %vm3_vm0 = vcmask 64512   ;;  %vm9_vm1 = vcmask 1048512   ;;  %vm15_vm2 = vcmask 982912   ;;  %vm21_vm3 = vcmask 917312   ;;  %s209_s0 = inlined_call_operand.vmem [shape: f32[16,8], index: 0, kind: input, shape index: {}]   ;;  %s210_s1 = inlined_call_operand.vmem [shape: f32[1,128], index: 1, kind: output, shape index: {}]  }
   0x1   :  { %v103_v0 = vld [vmem:[%s209_s0 + $0xf] sm:$0x1]   ;;  %v105_v1 = vld [vmem:[%s209_s0 + $0xd] sm:$0x1]   ;;  %v104_v2 = vld [vmem:[%s209_s0 + $0xe] sm:$0x1]  }
   0x2   :  { %7 = vrot.lane.b32.xlu0 %v103_v0, %s133_s10  ;;  %19 = vrot.lane.b32.xlu1 %v105_v1, %s134_s11  ;;  %v106_v3 = vld [vmem:[%s209_s0 + $0xc] sm:$0x1]   ;;  %s135_s16 = smov 112   ;;  %s136_s17 = smov 96   ;;  %v107_v4 = vld [vmem:[%s209_s0 + $0xb] sm:$0x1]  }
   0x3   :  { %v108_v5 = vld [vmem:[%s209_s0 + $0xa] sm:$0x1]   ;;  %v2_v6 = vld [vmem:[%s209_s0] sm:$0x1]   ;;  %s137_s24 = smov 88   ;;  %s138_s25 = smov 80  }
   0x4   :  { %4 = vst.msk [vmem:[#allocation0] sm:$0x1] %vm3_vm0, %v2_v6   ;;  %v109_v7 = vld [vmem:[%s209_s0 + $0x9] sm:$0x1]   ;;  %v110_v8 = vld [vmem:[%s209_s0 + $0x8] sm:$0x1]  }
   0x5   :  { %s139_s30 = smov 72   ;;  %s140_s2 = smov 64   ;;  %v111_v9 = vld [vmem:[%s209_s0 + $0x7] sm:$0x1]   ;;  %v112_v10 = vld [vmem:[%s209_s0 + $0x6] sm:$0x1]  }
   0x6   :  { %13 = vrot.lane.b32.xlu0 %v104_v2, %s135_s16  ;;  %25 = vrot.lane.b32.xlu1 %v106_v3, %s136_s17  ;;  %s141_s7 = smov 56   ;;  %s142_s8 = smov 48   ;;  %v113_v11 = vld [vmem:[%s209_s0 + $0x5] sm:$0x1]   ;;  %v114_v12 = vld [vmem:[%s209_s0 + $0x4] sm:$0x1]  }
   0x7   :  { %s143_s13 = smov 40   ;;  %s144_s14 = smov 32   ;;  %v115_v13 = vld [vmem:[%s209_s0 + $0x3] sm:$0x1]   ;;  %v116_v14 = vld [vmem:[%s209_s0 + $0x2] sm:$0x1]  }
   0x8   :  { %s145_s19 = smov 24   ;;  %s146_s20 = smov 16   ;;  %v117_v15 = vld [vmem:[%s209_s0 + $0x1] sm:$0x1]   ;;  %vm27_vm4 = vcmask 851712   ;;  %vm33_vm5 = vcmask 786112  }
   0x9   :  { %s147_s0 = smov 8   ;;  %vm39_vm6 = vcmask 720512   ;;  %vm45_vm7 = vcmask 654912   ;;  %vm51_vm8 = vcmask 589312   ;;  %vm57_vm9 = vcmask 523712  }
   0xa   :  { %31 = vrot.lane.b32.xlu0 %v107_v4, %s137_s24  ;;  %37 = vrot.lane.b32.xlu1 %v108_v5, %s138_s25  ;;  %vm63_vm10 = vcmask 458112   ;;  %vm69_vm11 = vcmask 392512   ;;  %vm75_vm12 = vcmask 326912   ;;  %vm81_vm13 = vcmask 261312  }
   0xb   :  { %vm87_vm14 = vcmask 195712   ;;  %vm93_vm15 = vcmask 130112  }
   0xe   :  { %43 = vrot.lane.b32.xlu0 %v109_v7, %s139_s30  ;;  %49 = vrot.lane.b32.xlu1 %v110_v8, %s140_s2 }
  0x12   :  { %55 = vrot.lane.b32.xlu0 %v111_v9, %s141_s7  ;;  %61 = vrot.lane.b32.xlu1 %v112_v10, %s142_s8 }
  0x16   :  { %67 = vrot.lane.b32.xlu0 %v113_v11, %s143_s13  ;;  %73 = vrot.lane.b32.xlu1 %v114_v12, %s144_s14 }
  0x1a   :  { %79 = vrot.lane.b32.xlu0 %v115_v13, %s145_s19  ;;  %85 = vrot.lane.b32.xlu1 %v116_v14, %s146_s20 }
  0x1e   :  { %91 = vrot.lane.b32.xlu0 %v117_v15, %s147_s0 }
  0x74   :  { %v8_v16 = vpop.permute.xlu0 %7   ;;  %v20_v17 = vpop.permute.xlu1 %19  }
  0x75   :  { %10 = vst.msk [vmem:[#allocation0] sm:$0x1] %vm9_vm1, %v8_v16  }
  0x78   :  { %v14_v18 = vpop.permute.xlu0 %13   ;;  %v26_v19 = vpop.permute.xlu1 %25  }
  0x79   :  { %16 = vst.msk [vmem:[#allocation0] sm:$0x1] %vm15_vm2, %v14_v18  }
  0x7a   :  { %22 = vst.msk [vmem:[#allocation0] sm:$0x1] %vm21_vm3, %v20_v17  }
  0x7b   :  { %28 = vst.msk [vmem:[#allocation0] sm:$0x1] %vm27_vm4, %v26_v19  }
  0x7c   :  { %v32_v20 = vpop.permute.xlu0 %31   ;;  %v38_v21 = vpop.permute.xlu1 %37  }
  0x7d   :  { %34 = vst.msk [vmem:[#allocation0] sm:$0x1] %vm33_vm5, %v32_v20  }
  0x7e   :  { %40 = vst.msk [vmem:[#allocation0] sm:$0x1] %vm39_vm6, %v38_v21  }
  0x80   :  { %v44_v22 = vpop.permute.xlu0 %43   ;;  %v50_v23 = vpop.permute.xlu1 %49  }
  0x81   :  { %46 = vst.msk [vmem:[#allocation0] sm:$0x1] %vm45_vm7, %v44_v22  }
  0x82   :  { %52 = vst.msk [vmem:[#allocation0] sm:$0x1] %vm51_vm8, %v50_v23  }
  0x84   :  { %v56_v24 = vpop.permute.xlu0 %55   ;;  %v62_v25 = vpop.permute.xlu1 %61  }
  0x85   :  { %58 = vst.msk [vmem:[#allocation0] sm:$0x1] %vm57_vm9, %v56_v24  }
  0x86   :  { %64 = vst.msk [vmem:[#allocation0] sm:$0x1] %vm63_vm10, %v62_v25  }
  0x88   :  { %v68_v26 = vpop.permute.xlu0 %67   ;;  %v74_v27 = vpop.permute.xlu1 %73  }
  0x89   :  { %70 = vst.msk [vmem:[#allocation0] sm:$0x1] %vm69_vm11, %v68_v26  }
  0x8a   :  { %76 = vst.msk [vmem:[#allocation0] sm:$0x1] %vm75_vm12, %v74_v27  }
  0x8c   :  { %v80_v28 = vpop.permute.xlu0 %79   ;;  %v86_v29 = vpop.permute.xlu1 %85  }
  0x8d   :  { %82 = vst.msk [vmem:[#allocation0] sm:$0x1] %vm81_vm13, %v80_v28  }
  0x8e   :  { %88 = vst.msk [vmem:[#allocation0] sm:$0x1] %vm87_vm14, %v86_v29  }
  0x90   :  { %v92_v30 = vpop.permute.xlu0 %91  }
  0x91   :  { %94 = vst.msk [vmem:[#allocation0] sm:$0x1] %vm93_vm15, %v92_v30  }
  0x98   :  { %v99_v31 = vld [vmem:[#allocation0] sm:$0x1] }
  0x99   :  { %102 = vst [vmem:[%s210_s1] sm:$0x1] %v99_v31 }

// kernel: detection_resnet_bn2_forward.1
= control target key start
LH: loop header
LB: loop body
LE: loop exit
PB: predicated region body
PF: predicated region fallthrough
CT: control target
= control target key end

     0   :  { %11 = vsyncpa [#allocation6], 0  ;;  %s6742_s0 = inlined_call_operand.vmem [shape: f32[2,16,16], index: 0, kind: input, shape index: {}]   ;;  %s6743_s1 = inlined_call_operand.vmem [shape: bf16[5,16,128], index: 1, kind: input, shape index: {}]   ;;  %s6744_s2 = inlined_call_operand.vmem [shape: bf16[8,3,128,128], index: 2, kind: input, shape index: {}]   ;;  %s6745_s3 = inlined_call_operand.vmem [shape: bf16[3,128,16], index: 3, kind: input, shape index: {}]   ;;  %s6746_s4 = inlined_call_operand.vmem [shape: f32[10,128], index: 4, kind: input, shape index: {}]   ;;  %s6747_s5 = inlined_call_operand.vmem [shape: f32[4,128], index: 5, kind: input, shape index: {}]   ;;  %s6748_s6 = inlined_call_operand.hbm [shape: f32[2,16,16], index: 6, kind: output, shape index: {}]  }
   0x1   :  { %13 = vsyncpa [#allocation6 + $0x1], 0  ;;  %s5588_s21 = smov 0   ;;  %s5590_s22 = smov 0  }
   0x2   :  { %s5592_s23 = smov 0   ;;  %s5594_s24 = smov 0  }
   0x3 LB: > { %s5609_s25 = sadd.s32 4294967295, %s5546_s24   ;;  %s3736_s26 = sadd.s32 4294967294, %s5546_s24   ;;  %s5546_s24 = sphi %s5594_s24, %s6754_s24   ;;  %s5542_s23 = sphi %s5592_s23, %s6753_s23   ;;  %s5538_s22 = sphi %s5590_s22, %s6752_s22   ;;  %s5534_s21 = sphi %s5588_s21, %s6751_s21  }
   0x4   : > { %s5613_s27 = sadd.s32 1, %s5546_s24   ;;  %s157_s28 = sadd.s32 1, %s5542_s23 }
   0x5   : > { %s154_s29 = ssub.s32 %s5546_s24, %s5613_s27  ;;  %p167_p0 = scmp.ne.s32.totalorder %s5542_s23, %s5538_s22 }
   0x6   : > { %p155_p1 = scmp.eq.s32.totalorder %s154_s29, 0  ;;  %p168_p2 = scmp.eq.s32.totalorder %s5609_s25, 1 }
   0x7   : > { %p173_p3 = scmp.ne.s32.totalorder %s5538_s22, %s5534_s21  ;;  %p174_p4 = scmp.eq.s32.totalorder %s3736_s26, 1 }
   0x8   : > { %s5624_s30 = scalar_select %p155_p1, %s5542_s23, %s157_s28  }
   0x9   : > { %p5626_p5 = por %p168_p2, %p167_p0  ;;  %p5630_p6 = por %p174_p4, %p173_p3 }
   0xa   : > { %p3739_p7 = scmp.ge.s32.totalorder %s5546_s24, 1  ;;  %p215_p8 = scmp.lt.s32.totalorder %s5546_s24, 3 }
   0xc   : > { %p216_p9 = pnand %p3739_p7, %p215_p8 }
   0xd   : > { %p245_p10 = scmp.lt.s32.totalorder (!%p216_p9), %s5609_s25, 1  ;;  %s4397_s29 = sshll.u32 (!%p216_p9), %s5609_s25, 8 }
   0xe   : > { %219 = sbr.rel (%p216_p9) target bundleno = 2409 (0x969), region = 44  ;;  %s5550_s13 = smov (!%p216_p9), [#allocation5]  }
  0x13   : > { %v5264_v0 = vld [vmem:[%s6743_s1 + $0x8] sm:$0xff]   ;;  %v5548_v1 = vmov 0.0   ;;  %vm251_vm0 = vcmask 130048   ;;  %vm254_vm1 = vcmask 125952   ;;  %vm5549_vm2 = vmmov 0   ;;  %s246_s11 = scalar_select %p245_p10, %s5609_s25, 1 }
  0x14   : > { %4651 = vmatprep.subr.bf16.mxu0 %v5548_v1  ;;  %256 = vst [vmem:[#allocation3] sm:$0xff] %v5548_v1  ;;  %257 = vst [vmem:[#allocation3 + $0x8] sm:$0xff] %v5548_v1  ;;  %4669 = vmatprep.subr.bf16.mxu1 %v5548_v1  ;;  %v5267_v2 = vld [vmem:[%s6743_s1 + $0x18] sm:$0xff]   ;;  %v5265_v7 = vld [vmem:[%s6743_s1] sm:$0xff]  }
  0x15   : > { %258 = vst [vmem:[#allocation3 + $0x10] sm:$0x3] %v5548_v1  ;;  %259 = vst [vmem:[#allocation4] sm:$0xff] %v5548_v1  ;;  %4652 = vmatpush3.bf16.msra.mxu0 %v5264_v0  ;;  %4653 = vmatprep.mubr.msk.bf16.mxu0 %vm5549_vm2, %v5548_v1  ;;  %s4396_s14 = sshll.u32 %s246_s11, 4  ;;  %v5266_v14 = vld [vmem:[%s6743_s1 + $0x10] sm:$0xff]   ;;  %v5268_v18 = vld [vmem:[%s6743_s1 + $0x20] sm:$0xff]   ;;  %s6697_s11 = scalar_lea.hbm %s6748_s6, %s4397_s29 }
  0x16   : > { %260 = vst [vmem:[#allocation4 + $0x8] sm:$0xff] %v5548_v1  ;;  %261 = vst [vmem:[#allocation4 + $0x10] sm:$0x3] %v5548_v1  ;;  %4657 = vmatprep.subr.bf16.mxu0 %v5548_v1  ;;  %4671 = vmatprep.mubr.msk.bf16.mxu1 %vm5549_vm2, %v5548_v1  ;;  %s249_s17 = scalar_lea.vmem %s6742_s0, %s4396_s14  ;;  %v5269_v23 = vld [vmem:[%s6744_s2 + $0x78] sm:$0xff]   ;;  %v5271_v24 = vld [vmem:[%s6744_s2 + $0x70] sm:$0xff]   ;;  %s5490_s14 = sshll.u32 %s5550_s13, 4  ;;  %s5491_s14 = int_to_ptr.vmem [resolvable:$false] %s5490_s14 }
  0x17   : > { %252 = vst.msk [vmem:[#allocation2] sm:$0xff] %vm251_vm0, %v5548_v1  ;;  %253 = vst.msk [vmem:[#allocation2 + $0x8] sm:$0xff] %vm251_vm0, %v5548_v1  ;;  %4670 = vmatpush3.bf16.msra.mxu1 %v5267_v2  ;;  %v262_v3 = vld [vmem:[%s249_s17] sm:$0xff]  ;;  %v263_v4 = vld [vmem:[%s249_s17 + $0x8] sm:$0xff]  ;;  %s242_s17 = sand.u32 1, %s5538_s22   ;;  %s5492_s15 = scalar_lea.vmem %s5491_s14, 512 }
  0x18   : > { %255 = vst.msk [vmem:[#allocation2 + $0x10] sm:$0xf] %vm254_vm1, %v5548_v1  ;;  %4681 = vmatprep.subr.bf16.mxu1 %v5548_v1  ;;  %v5273_v25 = vld [vmem:[%s6744_s2 + $0x68] sm:$0xff]   ;;  %v5270_v26 = vld [vmem:[%s6744_s2 + $0x38] sm:$0xff]   ;;  %v5275_v27 = vld [vmem:[%s6744_s2 + $0x60] sm:$0xff]   ;;  %s3740_s18 = sshll.u32 %s242_s17, 4 }
  0x19   : > { %264 = vst.msk [vmem:[#allocation2 + $0x2] sm:$0xff] %vm251_vm0, %v262_v3  ;;  %265 = vst.msk [vmem:[#allocation2 + $0xa] sm:$0xff] %vm251_vm0, %v263_v4  ;;  %v5272_v28 = vld [vmem:[%s6744_s2 + $0x30] sm:$0xff]   ;;  %v5277_v29 = vld [vmem:[%s6744_s2 + $0x58] sm:$0xff]   ;;  %s244_s26 = scalar_lea.vmem [#allocation5], %s3740_s18  ;;  %s6702_s12 = scalar_lea.sflag [#allocation6], %s242_s17 }
  0x1a   : > { %v5274_v30 = vld [vmem:[%s6744_s2 + $0x28] sm:$0xff]   ;;  %v5279_v31 = vld [vmem:[%s6744_s2 + $0x50] sm:$0xff]   ;;  %v5276_v32 = vld [vmem:[%s6744_s2 + $0x20] sm:$0xff]   ;;  %s3674_s28 = sshll.u32 %s244_s26, 4  ;;  %s6699_s28 = int_to_ptr.vmem [resolvable:$true] %s3674_s28 }
  0x1b   : > { %v5281_v33 = vld [vmem:[%s6744_s2 + $0x48] sm:$0xff]   ;;  %v5278_v34 = vld [vmem:[%s6744_s2 + $0x18] sm:$0xff]   ;;  %v5283_v35 = vld [vmem:[%s6744_s2 + $0x40] sm:$0xff]   ;;  %s5486_s25 = scalar_lea.vmem %s6699_s28, 256  ;;  %p5493_p0 = scmp.lt.s32.totalorder %s6699_s28, %s5491_s14 }
  0x1c   : > { %v5280_v36 = vld [vmem:[%s6744_s2 + $0x10] sm:$0xff]   ;;  %v5282_v37 = vld [vmem:[%s6744_s2 + $0x8] sm:$0xff]   ;;  %v5284_v38 = vld [vmem:[%s6744_s2] sm:$0xff]   ;;  %p5487_p11 = scmp.ne.s32.totalorder %s6699_s28, %s5486_s25  ;;  %p5494_p1 = scmp.lt.s32.totalorder %s5492_s15, %s5486_s25 }
  0x1d   : > { %v3761_v61 = vld [vmem:[%s6746_s4] ss:$0 sm:$0xff] }
  0x1e   : > { %p5488_p12 = pnand %p5487_p11, %p5626_p5  ;;  %p5495_p2 = por %p5494_p1, %p5493_p0 }
  0x20   : > { %v271_v5 = vld [vmem:[#allocation2 + $0x1] sm:$0xff]  ;;  %v272_v6 = vld [vmem:[#allocation2 + $0x9] sm:$0xff]  ;;  %p5489_p13 = pneg %p5488_p12 }
  0x21   : > { %v273_v8 = vpack.c.bf16 %v272_v6, %v271_v5  ;;  %v266_v9 = vld [vmem:[#allocation2] sm:$0xff]  ;;  %v436_v11 = vld [vmem:[#allocation2 + $0xb] sm:$0xff]  ;;  %v5285_v6 = vld [vmem:[%s6744_s2 + $0xb8] sm:$0xff]  }
  0x22   : > { %v435_v10 = vld [vmem:[#allocation2 + $0x3] sm:$0xff]  ;;  %v494_v21 = vld [vmem:[#allocation2 + $0xc] sm:$0xff]  ;;  %p5496_p3 = pnand %p5495_p2, %p5489_p13 }
  0x23   : > { %4654 = vmatmul.mubr.msk.bf16.vlgmr.msra.gmra.mxu0 %vm251_vm0, %v273_v8  ;;  %v267_v12 = vld [vmem:[#allocation2 + $0x8] sm:$0xff]  ;;  %v437_v13 = vpack.c.bf16 %v436_v11, %v435_v10  ;;  %v5286_v8 = vld [vmem:[%s6744_s2 + $0xb0] sm:$0xff]  }
  0x24   : > { %4658 = vmatpush3.bf16.msra.mxu0 %v5265_v7  ;;  %4659 = vmatprep.mubr.msk.bf16.mxu0 %vm5549_vm2, %v5548_v1  ;;  %v268_v15 = vpack.c.bf16 %v267_v12, %v266_v9  ;;  %v377_v16 = vld [vmem:[#allocation2 + $0x2] sm:$0xff]  ;;  %v378_v17 = vld [vmem:[#allocation2 + $0xa] sm:$0xff] }
  0x25   : > { %4663 = vmatprep.subr.bf16.mxu0 %v5548_v1  ;;  %4672 = vmatmul.mubr.msk.bf16.vlgmr.msra.gmra.mxu1 %vm251_vm0, %v437_v13  ;;  %v379_v19 = vpack.c.bf16 %v378_v17, %v377_v16  ;;  %v493_v20 = vld [vmem:[#allocation2 + $0x4] sm:$0xff]  ;;  %v5776_v9 = vld [vmem:[#allocation4] sm:$0xff] }
  0x26   : > { %4697 = vmatprep.mubr.msk.bf16.mxu1 %vm5549_vm2, %v5548_v1  ;;  %v495_v22 = vpack.c.bf16 %v494_v21, %v493_v20  ;;  %4682 = vmatpush3.bf16.msra.mxu1 %v5269_v23  ;;  %v5287_v12 = vld [vmem:[%s6744_s2 + $0xa8] sm:$0xff]   ;;  %v5290_v16 = vld [vmem:[%s6744_s2 + $0x90] sm:$0xff]   ;;  %v5294_v23 = vld [vmem:[%s6744_s2 + $0xf8] sm:$0xff]  }
  0x27   : > { %4683 = vmatprep.subr.bf16.mxu1 %v5548_v1  ;;  %v5291_v17 = vld [vmem:[%s6744_s2 + $0x88] sm:$0xff]  }
  0x2a   : > { %4684 = vmatpush3.bf16.msra.mxu1 %v5271_v24  ;;  %v5295_v24 = vld [vmem:[%s6744_s2 + $0x130] sm:$0xff]  }
  0x2b   : > { %4660 = vmatmul.mubr.msk.bf16.vlgmr.msra.gmra.mxu0 %vm251_vm0, %v268_v15  ;;  %4685 = vmatprep.subr.bf16.mxu1 %v5548_v1  ;;  %v5289_v15 = vld [vmem:[%s6744_s2 + $0x98] sm:$0xff]  }
  0x2c   : > { %4664 = vmatpush3.bf16.msra.mxu0 %v5266_v14  ;;  %4665 = vmatprep.mubr.msk.bf16.mxu0 %vm5549_vm2, %v5548_v1  ;;  %v5288_v14 = vld [vmem:[%s6744_s2 + $0xa0] sm:$0xff]  }
  0x2d   : > { %4675 = vmatprep.subr.bf16.mxu0 %v5548_v1 }
  0x2e   : > { %4686 = vmatpush3.bf16.msra.mxu1 %v5273_v25  ;;  %v5296_v25 = vld [vmem:[%s6744_s2 + $0xf0] sm:$0xff]  }
  0x2f   : > { %4687 = vmatprep.subr.bf16.mxu1 %v5548_v1 }
  0x32   : > { %4688 = vmatpush3.bf16.msra.mxu1 %v5275_v27  ;;  %v5298_v27 = vld [vmem:[%s6744_s2 + $0xe8] sm:$0xff]  }
  0x33   : > { %4666 = vmatmul.mubr.msk.bf16.vlgmr.msra.gmra.mxu0 %vm251_vm0, %v379_v19  ;;  %4689 = vmatprep.subr.bf16.mxu1 %v5548_v1 }
  0x34   : > { %4676 = vmatpush3.bf16.msra.mxu0 %v5268_v18  ;;  %4677 = vmatprep.mubr.msk.bf16.mxu0 %vm5549_vm2, %v5548_v1  ;;  %v5292_v18 = vld [vmem:[%s6744_s2 + $0x80] sm:$0xff]  }
  0x35   : > { %4701 = vmatprep.subr.bf16.mxu0 %v5548_v1 }
  0x36   : > { %4690 = vmatpush3.bf16.msra.mxu1 %v5277_v29  ;;  %v5301_v29 = vld [vmem:[%s6744_s2 + $0x118] sm:$0xff]  }
  0x37   : > { %4691 = vmatprep.subr.bf16.mxu1 %v5548_v1 }
  0x3a   : > { %4692 = vmatpush3.bf16.msra.mxu1 %v5279_v31  ;;  %v5300_v31 = vld [vmem:[%s6744_s2 + $0xe0] sm:$0xff]  }
  0x3b   : > { %4678 = vmatmul.mubr.msk.bf16.vlgmr.msra.gmra.mxu0 %vm251_vm0, %v495_v22  ;;  %4693 = vmatprep.subr.bf16.mxu1 %v5548_v1  ;;  %v5293_v22 = vld [vmem:[%s6744_s2 + $0x138] sm:$0xff]  }
  0x3c   : > { %4717 = vmatprep.mubr.msk.bf16.mxu0 %vm5549_vm2, %v5548_v1  ;;  %4702 = vmatpush3.bf16.msra.mxu0 %v5270_v26  ;;  %v5297_v26 = vld [vmem:[%s6744_s2 + $0x128] sm:$0xff]  }
  0x3d   : > { %4703 = vmatprep.subr.bf16.mxu0 %v5548_v1 }
  0x3e   : > { %4694 = vmatpush3.bf16.msra.mxu1 %v5281_v33  ;;  %v5302_v33 = vld [vmem:[%s6744_s2 + $0xd8] sm:$0xff]  }
  0x3f   : > { %4695 = vmatprep.subr.bf16.mxu1 %v5548_v1 }
  0x40   : > { %4704 = vmatpush3.bf16.msra.mxu0 %v5272_v28  ;;  %v5299_v28 = vld [vmem:[%s6744_s2 + $0x120] sm:$0xff]  }
  0x41   : > { %4705 = vmatprep.subr.bf16.mxu0 %v5548_v1 }
  0x42   : > { %4696 = vmatpush3.bf16.msra.mxu1 %v5283_v35  ;;  %v5304_v35 = vld [vmem:[%s6744_s2 + $0xd0] sm:$0xff]  }
  0x43   : > { %4721 = vmatprep.subr.bf16.mxu1 %v5548_v1 }
  0x44   : > { %4706 = vmatpush3.bf16.msra.mxu0 %v5274_v30  ;;  %v5303_v30 = vld [vmem:[%s6744_s2 + $0x110] sm:$0xff]  }
  0x45   : > { %4707 = vmatprep.subr.bf16.mxu0 %v5548_v1 }
  0x48   : > { %4708 = vmatpush3.bf16.msra.mxu0 %v5276_v32  ;;  %v5305_v32 = vld [vmem:[%s6744_s2 + $0x108] sm:$0xff]  }
  0x49   : > { %4709 = vmatprep.subr.bf16.mxu0 %v5548_v1 }
  0x4c   : > { %4710 = vmatpush3.bf16.msra.mxu0 %v5278_v34  ;;  %v5307_v34 = vld [vmem:[%s6744_s2 + $0x100] sm:$0xff]  }
  0x4d   : > { %4711 = vmatprep.subr.bf16.mxu0 %v5548_v1 }
  0x50   : > { %4712 = vmatpush3.bf16.msra.mxu0 %v5280_v36  ;;  %v5306_v36 = vld [vmem:[%s6744_s2 + $0xc8] sm:$0xff]  }
  0x51   : > { %4713 = vmatprep.subr.bf16.mxu0 %v5548_v1 }
  0x54   : > { %4714 = vmatpush3.bf16.msra.mxu0 %v5282_v37  ;;  %v5308_v37 = vld [vmem:[%s6744_s2 + $0xc0] sm:$0xff]  }
  0x55   : > { %4715 = vmatprep.subr.bf16.mxu0 %v5548_v1 }
  0x58   : > { %4716 = vmatpush3.bf16.msra.mxu0 %v5284_v38 }
  0x59   : > { %4741 = vmatprep.subr.bf16.mxu0 %v5548_v1 }
  0xe3   : > { %v320_v39 = vpop.f32.mrf.mxu0 }
  0xe5   : > { %v4655_v40 = vpop.f32.mrf.mxu0  ;;  %v484_v41 = vpop.f32.mrf.mxu1 }
  0xe7   : > { %v323_v42 = vpop.f32.mrf.mxu0  ;;  %v4673_v43 = vpop.f32.mrf.mxu1 }
  0xe9   : > { %v4656_v44 = vpop.f32.mrf.mxu0  ;;  %v487_v45 = vpop.f32.mrf.mxu1 }
  0xeb   : > { %v370_v46 = vpop.f32.mrf.mxu0  ;;  %v4674_v47 = vpop.f32.mrf.mxu1 }
  0xec   : > { %v371_v52 = vadd.f32 %v370_v46, %v320_v39 }
  0xed   : > { %v4661_v48 = vpop.f32.mrf.mxu0 }
  0xee   : > { %v3818_v48 = vld [vmem:[%s6746_s4 + $0x1] ss:$0 sm:$0xff] }
  0xef   : > { %v373_v49 = vpop.f32.mrf.mxu0 }
  0xf0   : > { %v374_v56 = vadd.f32 %v373_v49, %v323_v42 }
  0xf1   : > { %v4662_v50 = vpop.f32.mrf.mxu0 }
  0xf2   : > { %v3819_v50 = vld [vmem:[%s6747_s5] ss:$0 sm:$0xff] }
  0xf3   : > { %v426_v51 = vpop.f32.mrf.mxu0 }
  0xf4   : > { %v433_v54 = vadd.f32 %v426_v51, %v371_v52 }
  0xf5   : > { %v4667_v53 = vpop.f32.mrf.mxu0 }
  0xf6   : > { %v491_v58 = vadd.f32 %v484_v41, %v433_v54 }
  0xf7   : > { %v429_v55 = vpop.f32.mrf.mxu0 }
  0xf8   : > { %v434_v59 = vadd.f32 %v429_v55, %v374_v56 }
  0xf9   : > { %v4668_v57 = vpop.f32.mrf.mxu0 }
  0xfa   : > { %v492_v0 = vadd.f32 %v487_v45, %v434_v59 }
  0xfb   : > { %v542_v60 = vpop.f32.mrf.mxu0 }
  0xfc   : > { %v549_v62 = vadd.f32 %v542_v60, %v491_v58 }
  0xfd   : > { %v4679_v63 = vpop.f32.mrf.mxu0 }
  0xfe   : > { %v5762_v1 = vadd.f32 %v3761_v61, %v549_v62  ;;  %v5309_v62 = vld [vmem:[%s6744_s2 + $0x178] sm:$0xff]  }
  0xff   : > { %v545_v2 = vpop.f32.mrf.mxu0 }
 0x100   : > { %558 = vst [vmem:[#allocation3 + $0x1] sm:$0xff] %v5762_v1  ;;  %v550_v3 = vadd.f32 %v545_v2, %v492_v0  ;;  %v5310_v0 = vld [vmem:[%s6744_s2 + $0x170] sm:$0xff]  }
 0x101   : > { %v4680_v4 = vpop.f32.mrf.mxu0 }
 0x102   : > { %v5765_v5 = vadd.f32 %v3761_v61, %v550_v3  ;;  %v5311_v4 = vld [vmem:[%s6744_s2 + $0x168] sm:$0xff]  }
 0x104   : > { %559 = vst [vmem:[#allocation3 + $0x9] sm:$0xff] %v5765_v5  ;;  %v581_v7 = vpack.c.bf16 %v5765_v5, %v5762_v1 }
 0x106   : > { %4698 = vmatmul.mubr.bf16.vlgmr.msra.gmra.mxu1 %v581_v7  ;;  %v5312_v7 = vld [vmem:[%s6744_s2 + $0x160] sm:$0xff]  }
 0x107   : > { %4722 = vmatpush3.bf16.msra.mxu1 %v5285_v6  ;;  %4737 = vmatprep.mubr.msk.bf16.mxu1 %vm5549_vm2, %v5776_v9  ;;  %v560_v10 = vld [vmem:[#allocation3] sm:$0xff] }
 0x108   : > { %4723 = vmatprep.subr.bf16.mxu1 %v5776_v9 }
 0x10b   : > { %v561_v11 = vld [vmem:[#allocation3 + $0x8] sm:$0xff]  ;;  %4724 = vmatpush3.bf16.msra.mxu1 %v5286_v8  ;;  %v5313_v8 = vld [vmem:[%s6744_s2 + $0x158] sm:$0xff]  }
 0x10c   : > { %v562_v13 = vpack.c.bf16 %v561_v11, %v560_v10  ;;  %4725 = vmatprep.subr.bf16.mxu1 %v5776_v9  ;;  %v777_v19 = vld [vmem:[#allocation3 + $0x2] sm:$0xff]  ;;  %v778_v20 = vld [vmem:[#allocation3 + $0xa] sm:$0xff]  ;;  %v5314_v10 = vld [vmem:[%s6744_s2 + $0x150] sm:$0xff]  }
 0x10d   : > { %v779_v21 = vpack.c.bf16 %v778_v20, %v777_v19  ;;  %v5315_v11 = vld [vmem:[%s6744_s2 + $0x148] sm:$0xff]   ;;  %v5320_v19 = vld [vmem:[%s6744_s2 + $0x1b0] sm:$0xff]  }
 0x10e   : > { %4718 = vmatmul.mubr.bf16.vlgmr.msra.gmra.mxu0 %v562_v13  ;;  %v5321_v20 = vld [vmem:[%s6744_s2 + $0x1e8] sm:$0xff]  }
 0x10f   : > { %4726 = vmatpush3.bf16.msra.mxu1 %v5287_v12  ;;  %4757 = vmatprep.mubr.msk.bf16.mxu0 %vm5549_vm2, %v5776_v9  ;;  %v5316_v12 = vld [vmem:[%s6744_s2 + $0x140] sm:$0xff]  }
 0x110   : > { %4727 = vmatprep.subr.bf16.mxu1 %v5776_v9  ;;  %4742 = vmatpush3.bf16.msra.mxu0 %v5293_v22  ;;  %v5323_v22 = vld [vmem:[%s6744_s2 + $0x1e0] sm:$0xff]  }
 0x111   : > { %4743 = vmatprep.subr.bf16.mxu0 %v5776_v9 }
 0x113   : > { %4728 = vmatpush3.bf16.msra.mxu1 %v5288_v14 }
 0x114   : > { %4729 = vmatprep.subr.bf16.mxu1 %v5776_v9  ;;  %4744 = vmatpush3.bf16.msra.mxu0 %v5295_v24  ;;  %v5327_v24 = vld [vmem:[%s6744_s2 + $0x1d0] sm:$0xff]  }
 0x115   : > { %4745 = vmatprep.subr.bf16.mxu0 %v5776_v9 }
 0x117   : > { %4730 = vmatpush3.bf16.msra.mxu1 %v5289_v15 }
 0x118   : > { %4731 = vmatprep.subr.bf16.mxu1 %v5776_v9  ;;  %4746 = vmatpush3.bf16.msra.mxu0 %v5297_v26  ;;  %v5329_v26 = vld [vmem:[%s6744_s2 + $0x1c8] sm:$0xff]  }
 0x119   : > { %4747 = vmatprep.subr.bf16.mxu0 %v5776_v9 }
 0x11b   : > { %4732 = vmatpush3.bf16.msra.mxu1 %v5290_v16  ;;  %v5317_v16 = vld [vmem:[%s6744_s2 + $0x1f8] sm:$0xff]  }
 0x11c   : > { %4733 = vmatprep.subr.bf16.mxu1 %v5776_v9  ;;  %4748 = vmatpush3.bf16.msra.mxu0 %v5299_v28  ;;  %v5331_v28 = vld [vmem:[%s6744_s2 + $0x1c0] sm:$0xff]  }
 0x11d   : > { %4749 = vmatprep.subr.bf16.mxu0 %v5776_v9 }
 0x11f   : > { %4734 = vmatpush3.bf16.msra.mxu1 %v5291_v17  ;;  %v5318_v17 = vld [vmem:[%s6744_s2 + $0x1b8] sm:$0xff]  }
 0x120   : > { %4735 = vmatprep.subr.bf16.mxu1 %v5776_v9  ;;  %4750 = vmatpush3.bf16.msra.mxu0 %v5301_v29  ;;  %v5328_v29 = vld [vmem:[%s6744_s2 + $0x190] sm:$0xff]  }
 0x121   : > { %4751 = vmatprep.subr.bf16.mxu0 %v5776_v9 }
 0x123   : > { %4736 = vmatpush3.bf16.msra.mxu1 %v5292_v18  ;;  %v5319_v18 = vld [vmem:[%s6744_s2 + $0x1f0] sm:$0xff]  }
 0x124   : > { %4761 = vmatprep.subr.bf16.mxu1 %v5776_v9  ;;  %4752 = vmatpush3.bf16.msra.mxu0 %v5303_v30  ;;  %v5330_v30 = vld [vmem:[%s6744_s2 + $0x188] sm:$0xff]  }
 0x125   : > { %4753 = vmatprep.subr.bf16.mxu0 %v5776_v9 }
 0x126   : > { %4738 = vmatmul.mubr.bf16.vlgmr.msra.gmra.mxu1 %v779_v21  ;;  %v5322_v21 = vld [vmem:[%s6744_s2 + $0x1a8] sm:$0xff]  }
 0x127   : > { %4777 = vmatprep.mubr.msk.bf16.mxu1 %vm5549_vm2, %v5776_v9  ;;  %4762 = vmatpush3.bf16.msra.mxu1 %v5294_v23  ;;  %v5325_v23 = vld [vmem:[%s6744_s2 + $0x1d8] sm:$0xff]  }
 0x128   : > { %4763 = vmatprep.subr.bf16.mxu1 %v5776_v9  ;;  %4754 = vmatpush3.bf16.msra.mxu0 %v5305_v32 }
 0x129   : > { %4755 = vmatprep.subr.bf16.mxu0 %v5776_v9 }
 0x12b   : > { %4764 = vmatpush3.bf16.msra.mxu1 %v5296_v25  ;;  %v5324_v25 = vld [vmem:[%s6744_s2 + $0x1a0] sm:$0xff]  }
 0x12c   : > { %4765 = vmatprep.subr.bf16.mxu1 %v5776_v9  ;;  %4756 = vmatpush3.bf16.msra.mxu0 %v5307_v34 }
 0x12d   : > { %4781 = vmatprep.subr.bf16.mxu0 %v5776_v9 }
 0x12f   : > { %4766 = vmatpush3.bf16.msra.mxu1 %v5298_v27  ;;  %v5326_v27 = vld [vmem:[%s6744_s2 + $0x198] sm:$0xff]  }
 0x130   : > { %4767 = vmatprep.subr.bf16.mxu1 %v5776_v9 }
 0x133   : > { %4768 = vmatpush3.bf16.msra.mxu1 %v5300_v31  ;;  %v5332_v31 = vld [vmem:[%s6744_s2 + $0x180] sm:$0xff]  }
 0x134   : > { %4769 = vmatprep.subr.bf16.mxu1 %v5776_v9 }
 0x137   : > { %4770 = vmatpush3.bf16.msra.mxu1 %v5302_v33 }
 0x138   : > { %4771 = vmatprep.subr.bf16.mxu1 %v5776_v9 }
 0x13b   : > { %4772 = vmatpush3.bf16.msra.mxu1 %v5304_v35 }
 0x13c   : > { %4773 = vmatprep.subr.bf16.mxu1 %v5776_v9 }
 0x13f   : > { %4774 = vmatpush3.bf16.msra.mxu1 %v5306_v36 }
 0x140   : > { %4775 = vmatprep.subr.bf16.mxu1 %v5776_v9 }
 0x143   : > { %4776 = vmatpush3.bf16.msra.mxu1 %v5308_v37 }
 0x144   : > { %4801 = vmatprep.subr.bf16.mxu1 %v5776_v9 }
 0x1c6   : > { %v681_v38 = vpop.f32.mrf.mxu1 }
 0x1c8   : > { %v4699_v39 = vpop.f32.mrf.mxu1 }
 0x1ca   : > { %v684_v40 = vpop.f32.mrf.mxu1 }
 0x1cc   : > { %v4700_v41 = vpop.f32.mrf.mxu1 }
 0x1ce   : > { %v770_v42 = vpop.f32.mrf.mxu0 }
 0x1cf   : > { %v771_v46 = vadd.f32 %v770_v42, %v681_v38  ;;  %v3892_v42 = vld [vmem:[%s6746_s4 + $0x2] ss:$0 sm:$0xff] }
 0x1d0   : > { %v4719_v43 = vpop.f32.mrf.mxu0 }
 0x1d2   : > { %v773_v44 = vpop.f32.mrf.mxu0 }
 0x1d3   : > { %v774_v52 = vadd.f32 %v773_v44, %v684_v40 }
 0x1d4   : > { %v4720_v45 = vpop.f32.mrf.mxu0 }
 0x1e6   : > { %v879_v47 = vpop.f32.mrf.mxu1 }
 0x1e7   : > { %v886_v49 = vadd.f32 %v879_v47, %v771_v46 }
 0x1e8   : > { %v4739_v51 = vpop.f32.mrf.mxu1 }
 0x1e9   : > { %v893_v53 = vadd.f32 %v3818_v48, %v886_v49 }
 0x1ea   : > { %v882_v54 = vpop.f32.mrf.mxu1 }
 0x1eb   : > { %vm895_vm3 = vcmp.ge.f32.partialorder %v893_v53, 0.0  ;;  %v902_v55 = vmul.f32 %v3819_v50, %v893_v53  ;;  %v887_v56 = vadd.f32 %v882_v54, %v774_v52 }
 0x1ec   : > { %v4740_v57 = vpop.f32.mrf.mxu1 }
 0x1ed   : > { %v904_v58 = vsel %vm895_vm3, %v893_v53, %v902_v55  ;;  %v894_v59 = vadd.f32 %v3818_v48, %v887_v56  ;;  %v5333_v53 = vld [vmem:[%s6744_s2 + $0x238] sm:$0xff]   ;;  %v5335_v56 = vld [vmem:[%s6744_s2 + $0x228] sm:$0xff]  }
 0x1ee   : > { %906 = vst [vmem:[#allocation4 + $0x1] sm:$0xff] %v904_v58 }
 0x1ef   : > { %vm896_vm4 = vcmp.ge.f32.partialorder %v894_v59, 0.0  ;;  %v903_v60 = vmul.f32 %v3819_v50, %v894_v59 }
 0x1f1   : > { %v905_v61 = vsel %vm896_vm4, %v894_v59, %v903_v60  ;;  %v5337_v59 = vld [vmem:[%s6744_s2 + $0x218] sm:$0xff]   ;;  %v5338_v60 = vld [vmem:[%s6744_s2 + $0x210] sm:$0xff]  }
 0x1f2   : > { %907 = vst [vmem:[#allocation4 + $0x9] sm:$0xff] %v905_v61  ;;  %v930_v63 = vpack.c.bf16 %v905_v61, %v904_v58  ;;  %v5336_v58 = vld [vmem:[%s6744_s2 + $0x220] sm:$0xff]   ;;  %v5339_v61 = vld [vmem:[%s6744_s2 + $0x208] sm:$0xff]  }
 0x1f4   : > { %4758 = vmatmul.mubr.bf16.vlgmr.msra.gmra.mxu0 %v930_v63 }
 0x1f5   : > { %4782 = vmatpush3.bf16.msra.mxu0 %v5309_v62  ;;  %4797 = vmatprep.mubr.msk.bf16.mxu0 %vm5549_vm2, %v5776_v9  ;;  %v908_v2 = vld [vmem:[#allocation4] sm:$0xff]  ;;  %v5340_v62 = vld [vmem:[%s6744_s2 + $0x200] sm:$0xff]  }
 0x1f6   : > { %4783 = vmatprep.subr.bf16.mxu0 %v5776_v9 }
 0x1f9   : > { %v909_v3 = vld [vmem:[#allocation4 + $0x8] sm:$0xff]  ;;  %4784 = vmatpush3.bf16.msra.mxu0 %v5310_v0 }
 0x1fa   : > { %v910_v6 = vpack.c.bf16 %v909_v3, %v908_v2  ;;  %4785 = vmatprep.subr.bf16.mxu0 %v5776_v9  ;;  %v1126_v13 = vld [vmem:[#allocation4 + $0x2] sm:$0xff]  ;;  %v1127_v14 = vld [vmem:[#allocation4 + $0xa] sm:$0xff] }
 0x1fb   : > { %v1128_v15 = vpack.c.bf16 %v1127_v14, %v1126_v13  ;;  %v5341_v3 = vld [vmem:[%s6744_s2 + $0x2b8] sm:$0xff]   ;;  %v5351_v13 = vld [vmem:[%s6744_s2 + $0x290] sm:$0xff]   ;;  %v5348_v14 = vld [vmem:[%s6744_s2 + $0x260] sm:$0xff]  }
 0x1fc   : > { %4778 = vmatmul.mubr.bf16.vlgmr.msra.gmra.mxu1 %v910_v6  ;;  %v5343_v6 = vld [vmem:[%s6744_s2 + $0x2b0] sm:$0xff]  }
 0x1fd   : > { %4786 = vmatpush3.bf16.msra.mxu0 %v5311_v4  ;;  %4817 = vmatprep.mubr.msk.bf16.mxu1 %vm5549_vm2, %v5776_v9  ;;  %v5342_v4 = vld [vmem:[%s6744_s2 + $0x278] sm:$0xff]  }
 0x1fe   : > { %4787 = vmatprep.subr.bf16.mxu0 %v5776_v9  ;;  %4802 = vmatpush3.bf16.msra.mxu1 %v5317_v16  ;;  %v5350_v16 = vld [vmem:[%s6744_s2 + $0x258] sm:$0xff]  }
 0x1ff   : > { %4803 = vmatprep.subr.bf16.mxu1 %v5776_v9 }
 0x201   : > { %4788 = vmatpush3.bf16.msra.mxu0 %v5312_v7  ;;  %v5344_v7 = vld [vmem:[%s6744_s2 + $0x270] sm:$0xff]  }
 0x202   : > { %4789 = vmatprep.subr.bf16.mxu0 %v5776_v9  ;;  %4804 = vmatpush3.bf16.msra.mxu1 %v5319_v18  ;;  %v5352_v18 = vld [vmem:[%s6744_s2 + $0x250] sm:$0xff]  }
 0x203   : > { %4805 = vmatprep.subr.bf16.mxu1 %v5776_v9 }
 0x205   : > { %4790 = vmatpush3.bf16.msra.mxu0 %v5313_v8  ;;  %v5345_v8 = vld [vmem:[%s6744_s2 + $0x2a8] sm:$0xff]  }
 0x206   : > { %4791 = vmatprep.subr.bf16.mxu0 %v5776_v9  ;;  %4806 = vmatpush3.bf16.msra.mxu1 %v5321_v20  ;;  %v5356_v20 = vld [vmem:[%s6744_s2 + $0x240] sm:$0xff]  }
 0x207   : > { %4807 = vmatprep.subr.bf16.mxu1 %v5776_v9 }
 0x209   : > { %4792 = vmatpush3.bf16.msra.mxu0 %v5314_v10  ;;  %v5346_v10 = vld [vmem:[%s6744_s2 + $0x268] sm:$0xff]  }
 0x20a   : > { %4793 = vmatprep.subr.bf16.mxu0 %v5776_v9  ;;  %4808 = vmatpush3.bf16.msra.mxu1 %v5323_v22 }
 0x20b   : > { %4809 = vmatprep.subr.bf16.mxu1 %v5776_v9 }
 0x20d   : > { %4794 = vmatpush3.bf16.msra.mxu0 %v5315_v11  ;;  %v5347_v11 = vld [vmem:[%s6744_s2 + $0x2a0] sm:$0xff]  }
 0x20e   : > { %4795 = vmatprep.subr.bf16.mxu0 %v5776_v9  ;;  %4810 = vmatpush3.bf16.msra.mxu1 %v5325_v23 }
 0x20f   : > { %4811 = vmatprep.subr.bf16.mxu1 %v5776_v9 }
 0x211   : > { %4796 = vmatpush3.bf16.msra.mxu0 %v5316_v12  ;;  %v5349_v12 = vld [vmem:[%s6744_s2 + $0x298] sm:$0xff]  }
 0x212   : > { %4821 = vmatprep.subr.bf16.mxu0 %v5776_v9  ;;  %4812 = vmatpush3.bf16.msra.mxu1 %v5327_v24 }
 0x213   : > { %4813 = vmatprep.subr.bf16.mxu1 %v5776_v9 }
 0x214   : > { %4798 = vmatmul.mubr.bf16.vlgmr.msra.gmra.mxu0 %v1128_v15  ;;  %v5353_v15 = vld [vmem:[%s6744_s2 + $0x288] sm:$0xff]  }
 0x215   : > { %4837 = vmatprep.mubr.msk.bf16.mxu0 %vm5549_vm2, %v5776_v9  ;;  %4822 = vmatpush3.bf16.msra.mxu0 %v5318_v17  ;;  %v5355_v17 = vld [vmem:[%s6744_s2 + $0x280] sm:$0xff]  }
 0x216   : > { %4823 = vmatprep.subr.bf16.mxu0 %v5776_v9  ;;  %4814 = vmatpush3.bf16.msra.mxu1 %v5329_v26 }
 0x217   : > { %4815 = vmatprep.subr.bf16.mxu1 %v5776_v9 }
 0x219   : > { %4824 = vmatpush3.bf16.msra.mxu0 %v5320_v19  ;;  %v5354_v19 = vld [vmem:[%s6744_s2 + $0x248] sm:$0xff]  }
 0x21a   : > { %4825 = vmatprep.subr.bf16.mxu0 %v5776_v9  ;;  %4816 = vmatpush3.bf16.msra.mxu1 %v5331_v28 }
 0x21b   : > { %4841 = vmatprep.subr.bf16.mxu1 %v5776_v9 }
 0x21d   : > { %4826 = vmatpush3.bf16.msra.mxu0 %v5322_v21 }
 0x21e   : > { %4827 = vmatprep.subr.bf16.mxu0 %v5776_v9 }
 0x221   : > { %4828 = vmatpush3.bf16.msra.mxu0 %v5324_v25 }
 0x222   : > { %4829 = vmatprep.subr.bf16.mxu0 %v5776_v9 }
 0x225   : > { %4830 = vmatpush3.bf16.msra.mxu0 %v5326_v27 }
 0x226   : > { %4831 = vmatprep.subr.bf16.mxu0 %v5776_v9 }
 0x229   : > { %4832 = vmatpush3.bf16.msra.mxu0 %v5328_v29 }
 0x22a   : > { %4833 = vmatprep.subr.bf16.mxu0 %v5776_v9 }
 0x22d   : > { %4834 = vmatpush3.bf16.msra.mxu0 %v5330_v30 }
 0x22e   : > { %4835 = vmatprep.subr.bf16.mxu0 %v5776_v9 }
 0x231   : > { %4836 = vmatpush3.bf16.msra.mxu0 %v5332_v31  ;;  %v3965_v31 = vld [vmem:[%s6746_s4 + $0x3] ss:$0 sm:$0xff] }
 0x232   : > { %4861 = vmatprep.subr.bf16.mxu0 %v5776_v9 }
 0x2b4   : > { %v1030_v32 = vpop.f32.mrf.mxu0 }
 0x2b6   : > { %v4759_v33 = vpop.f32.mrf.mxu0 }
 0x2b7   : > { %v3966_v33 = vld [vmem:[%s6747_s5 + $0x1] ss:$0 sm:$0xff] }
 0x2b8   : > { %v1033_v34 = vpop.f32.mrf.mxu0 }
 0x2ba   : > { %v4760_v35 = vpop.f32.mrf.mxu0 }
 0x2bc   : > { %v1119_v36 = vpop.f32.mrf.mxu1 }
 0x2bd   : > { %v1120_v40 = vadd.f32 %v1119_v36, %v1030_v32 }
 0x2be   : > { %v4779_v37 = vpop.f32.mrf.mxu1 }
 0x2c0   : > { %v1122_v38 = vpop.f32.mrf.mxu1 }
 0x2c1   : > { %v1123_v45 = vadd.f32 %v1122_v38, %v1033_v34 }
 0x2c2   : > { %v4780_v39 = vpop.f32.mrf.mxu1 }
 0x2d4   : > { %v1228_v41 = vpop.f32.mrf.mxu0 }
 0x2d5   : > { %v1235_v43 = vadd.f32 %v1228_v41, %v1120_v40 }
 0x2d6   : > { %v4799_v44 = vpop.f32.mrf.mxu0 }
 0x2d7   : > { %v1242_v46 = vadd.f32 %v3892_v42, %v1235_v43 }
 0x2d8   : > { %v1231_v47 = vpop.f32.mrf.mxu0 }
 0x2d9   : > { %v5986_v48 = vadd.f32 %v1242_v46, %v5762_v1  ;;  %v1236_v49 = vadd.f32 %v1231_v47, %v1123_v45  ;;  %v5334_v1 = vld [vmem:[%s6744_s2 + $0x230] sm:$0xff]   ;;  %v5357_v45 = vld [vmem:[%s6744_s2 + $0x2f8] sm:$0xff]  }
 0x2da   : > { %v4800_v50 = vpop.f32.mrf.mxu0  ;;  %v5358_v47 = vld [vmem:[%s6744_s2 + $0x2f0] sm:$0xff]  }
 0x2db   : > { %1248 = vst [vmem:[#allocation3 + $0x1] sm:$0xff] %v5986_v48  ;;  %v1243_v51 = vadd.f32 %v3892_v42, %v1236_v49 }
 0x2dd   : > { %v5990_v52 = vadd.f32 %v1243_v51, %v5765_v5  ;;  %v5359_v51 = vld [vmem:[%s6744_s2 + $0x2e8] sm:$0xff]  }
 0x2df   : > { %1249 = vst [vmem:[#allocation3 + $0x9] sm:$0xff] %v5990_v52  ;;  %v1272_v54 = vpack.c.bf16 %v5990_v52, %v5986_v48 }
 0x2e1   : > { %4818 = vmatmul.mubr.bf16.vlgmr.msra.gmra.mxu1 %v1272_v54  ;;  %v5360_v54 = vld [vmem:[%s6744_s2 + $0x2e0] sm:$0xff]  }
 0x2e2   : > { %4842 = vmatpush3.bf16.msra.mxu1 %v5333_v53  ;;  %4857 = vmatprep.mubr.msk.bf16.mxu1 %vm5549_vm2, %v5776_v9  ;;  %v1250_v5 = vld [vmem:[#allocation3] sm:$0xff] }
 0x2e3   : > { %4843 = vmatprep.subr.bf16.mxu1 %v5776_v9 }
 0x2e6   : > { %v1251_v55 = vld [vmem:[#allocation3 + $0x8] sm:$0xff]  ;;  %4844 = vmatpush3.bf16.msra.mxu1 %v5334_v1  ;;  %v5361_v1 = vld [vmem:[%s6744_s2 + $0x2d8] sm:$0xff]  }
 0x2e7   : > { %v1252_v57 = vpack.c.bf16 %v1251_v55, %v1250_v5  ;;  %4845 = vmatprep.subr.bf16.mxu1 %v5776_v9  ;;  %v1468_v63 = vld [vmem:[#allocation3 + $0x2] sm:$0xff]  ;;  %v1469_v0 = vld [vmem:[#allocation3 + $0xa] sm:$0xff]  ;;  %v5362_v5 = vld [vmem:[%s6744_s2 + $0x2d0] sm:$0xff]  }
 0x2e8   : > { %v1470_v2 = vpack.c.bf16 %v1469_v0, %v1468_v63  ;;  %v5363_v55 = vld [vmem:[%s6744_s2 + $0x2c8] sm:$0xff]   ;;  %v5368_v63 = vld [vmem:[%s6744_s2 + $0x330] sm:$0xff]  }
 0x2e9   : > { %4838 = vmatmul.mubr.bf16.vlgmr.msra.gmra.mxu0 %v1252_v57  ;;  %v5369_v0 = vld [vmem:[%s6744_s2 + $0x368] sm:$0xff]  }
 0x2ea   : > { %4846 = vmatpush3.bf16.msra.mxu1 %v5335_v56  ;;  %4877 = vmatprep.mubr.msk.bf16.mxu0 %vm5549_vm2, %v5776_v9  ;;  %v5364_v56 = vld [vmem:[%s6744_s2 + $0x2c0] sm:$0xff]  }
 0x2eb   : > { %4847 = vmatprep.subr.bf16.mxu1 %v5776_v9  ;;  %4862 = vmatpush3.bf16.msra.mxu0 %v5341_v3  ;;  %v5371_v3 = vld [vmem:[%s6744_s2 + $0x360] sm:$0xff]  }
 0x2ec   : > { %4863 = vmatprep.subr.bf16.mxu0 %v5776_v9 }
 0x2ee   : > { %4848 = vmatpush3.bf16.msra.mxu1 %v5336_v58 }
 0x2ef   : > { %4849 = vmatprep.subr.bf16.mxu1 %v5776_v9  ;;  %4864 = vmatpush3.bf16.msra.mxu0 %v5343_v6  ;;  %v5375_v6 = vld [vmem:[%s6744_s2 + $0x350] sm:$0xff]  }
 0x2f0   : > { %4865 = vmatprep.subr.bf16.mxu0 %v5776_v9 }
 0x2f2   : > { %4850 = vmatpush3.bf16.msra.mxu1 %v5337_v59 }
 0x2f3   : > { %4851 = vmatprep.subr.bf16.mxu1 %v5776_v9  ;;  %4866 = vmatpush3.bf16.msra.mxu0 %v5345_v8  ;;  %v5377_v8 = vld [vmem:[%s6744_s2 + $0x348] sm:$0xff]  }
 0x2f4   : > { %4867 = vmatprep.subr.bf16.mxu0 %v5776_v9 }
 0x2f6   : > { %4852 = vmatpush3.bf16.msra.mxu1 %v5338_v60  ;;  %v5365_v60 = vld [vmem:[%s6744_s2 + $0x378] sm:$0xff]  }
 0x2f7   : > { %4853 = vmatprep.subr.bf16.mxu1 %v5776_v9  ;;  %4868 = vmatpush3.bf16.msra.mxu0 %v5347_v11  ;;  %v5379_v11 = vld [vmem:[%s6744_s2 + $0x340] sm:$0xff]  }
 0x2f8   : > { %4869 = vmatprep.subr.bf16.mxu0 %v5776_v9 }
 0x2fa   : > { %4854 = vmatpush3.bf16.msra.mxu1 %v5339_v61  ;;  %v5366_v61 = vld [vmem:[%s6744_s2 + $0x338] sm:$0xff]  }
 0x2fb   : > { %4855 = vmatprep.subr.bf16.mxu1 %v5776_v9  ;;  %4870 = vmatpush3.bf16.msra.mxu0 %v5349_v12  ;;  %v5376_v12 = vld [vmem:[%s6744_s2 + $0x310] sm:$0xff]  }
 0x2fc   : > { %4871 = vmatprep.subr.bf16.mxu0 %v5776_v9 }
 0x2fe   : > { %4856 = vmatpush3.bf16.msra.mxu1 %v5340_v62  ;;  %v5367_v62 = vld [vmem:[%s6744_s2 + $0x370] sm:$0xff]  }
 0x2ff   : > { %4881 = vmatprep.subr.bf16.mxu1 %v5776_v9  ;;  %4872 = vmatpush3.bf16.msra.mxu0 %v5351_v13  ;;  %v5378_v13 = vld [vmem:[%s6744_s2 + $0x308] sm:$0xff]  }
 0x300   : > { %4873 = vmatprep.subr.bf16.mxu0 %v5776_v9 }
 0x301   : > { %4858 = vmatmul.mubr.bf16.vlgmr.msra.gmra.mxu1 %v1470_v2  ;;  %v5370_v2 = vld [vmem:[%s6744_s2 + $0x328] sm:$0xff]  }
 0x302   : > { %4897 = vmatprep.mubr.msk.bf16.mxu1 %vm5549_vm2, %v5776_v9  ;;  %4882 = vmatpush3.bf16.msra.mxu1 %v5342_v4  ;;  %v5373_v4 = vld [vmem:[%s6744_s2 + $0x358] sm:$0xff]  }
 0x303   : > { %4883 = vmatprep.subr.bf16.mxu1 %v5776_v9  ;;  %4874 = vmatpush3.bf16.msra.mxu0 %v5353_v15 }
 0x304   : > { %4875 = vmatprep.subr.bf16.mxu0 %v5776_v9 }
 0x306   : > { %4884 = vmatpush3.bf16.msra.mxu1 %v5344_v7  ;;  %v5372_v7 = vld [vmem:[%s6744_s2 + $0x320] sm:$0xff]  }
 0x307   : > { %4885 = vmatprep.subr.bf16.mxu1 %v5776_v9  ;;  %4876 = vmatpush3.bf16.msra.mxu0 %v5355_v17 }
 0x308   : > { %4901 = vmatprep.subr.bf16.mxu0 %v5776_v9 }
 0x30a   : > { %4886 = vmatpush3.bf16.msra.mxu1 %v5346_v10  ;;  %v5374_v10 = vld [vmem:[%s6744_s2 + $0x318] sm:$0xff]  }
 0x30b   : > { %4887 = vmatprep.subr.bf16.mxu1 %v5776_v9 }
 0x30e   : > { %4888 = vmatpush3.bf16.msra.mxu1 %v5348_v14  ;;  %v5380_v14 = vld [vmem:[%s6744_s2 + $0x300] sm:$0xff]  }
 0x30f   : > { %4889 = vmatprep.subr.bf16.mxu1 %v5776_v9 }
 0x312   : > { %4890 = vmatpush3.bf16.msra.mxu1 %v5350_v16 }
 0x313   : > { %4891 = vmatprep.subr.bf16.mxu1 %v5776_v9 }
 0x316   : > { %4892 = vmatpush3.bf16.msra.mxu1 %v5352_v18 }
 0x317   : > { %4893 = vmatprep.subr.bf16.mxu1 %v5776_v9 }
 0x31a   : > { %4894 = vmatpush3.bf16.msra.mxu1 %v5354_v19 }
 0x31b   : > { %4895 = vmatprep.subr.bf16.mxu1 %v5776_v9 }
 0x31e   : > { %4896 = vmatpush3.bf16.msra.mxu1 %v5356_v20 }
 0x31f   : > { %4921 = vmatprep.subr.bf16.mxu1 %v5776_v9 }
 0x3a1   : > { %v1372_v21 = vpop.f32.mrf.mxu1 }
 0x3a3   : > { %v4819_v22 = vpop.f32.mrf.mxu1 }
 0x3a5   : > { %v1375_v23 = vpop.f32.mrf.mxu1 }
 0x3a7   : > { %v4820_v24 = vpop.f32.mrf.mxu1 }
 0x3a9   : > { %v1461_v25 = vpop.f32.mrf.mxu0 }
 0x3aa   : > { %v1462_v29 = vadd.f32 %v1461_v25, %v1372_v21  ;;  %v4039_v25 = vld [vmem:[%s6746_s4 + $0x4] ss:$0 sm:$0xff] }
 0x3ab   : > { %v4839_v26 = vpop.f32.mrf.mxu0 }
 0x3ad   : > { %v1464_v27 = vpop.f32.mrf.mxu0 }
 0x3ae   : > { %v1465_v35 = vadd.f32 %v1464_v27, %v1375_v23 }
 0x3af   : > { %v4840_v28 = vpop.f32.mrf.mxu0 }
 0x3c1   : > { %v1570_v30 = vpop.f32.mrf.mxu1 }
 0x3c2   : > { %v1577_v32 = vadd.f32 %v1570_v30, %v1462_v29 }
 0x3c3   : > { %v4859_v34 = vpop.f32.mrf.mxu1 }
 0x3c4   : > { %v1584_v36 = vadd.f32 %v3965_v31, %v1577_v32 }
 0x3c5   : > { %v1573_v37 = vpop.f32.mrf.mxu1 }
 0x3c6   : > { %vm1586_vm5 = vcmp.ge.f32.partialorder %v1584_v36, 0.0  ;;  %v1593_v38 = vmul.f32 %v3966_v33, %v1584_v36  ;;  %v1578_v39 = vadd.f32 %v1573_v37, %v1465_v35 }
 0x3c7   : > { %v4860_v40 = vpop.f32.mrf.mxu1 }
 0x3c8   : > { %v1595_v41 = vsel %vm1586_vm5, %v1584_v36, %v1593_v38  ;;  %v1585_v42 = vadd.f32 %v3965_v31, %v1578_v39  ;;  %v5381_v36 = vld [vmem:[%s6744_s2 + $0x3b8] sm:$0xff]   ;;  %v5383_v39 = vld [vmem:[%s6744_s2 + $0x3a8] sm:$0xff]  }
 0x3c9   : > { %1597 = vst [vmem:[#allocation4 + $0x1] sm:$0xff] %v1595_v41 }
 0x3ca   : > { %vm1587_vm6 = vcmp.ge.f32.partialorder %v1585_v42, 0.0  ;;  %v1594_v43 = vmul.f32 %v3966_v33, %v1585_v42 }
 0x3cc   : > { %v1596_v44 = vsel %vm1587_vm6, %v1585_v42, %v1594_v43  ;;  %v5385_v42 = vld [vmem:[%s6744_s2 + $0x398] sm:$0xff]   ;;  %v5386_v43 = vld [vmem:[%s6744_s2 + $0x390] sm:$0xff]  }
 0x3cd   : > { %1598 = vst [vmem:[#allocation4 + $0x9] sm:$0xff] %v1596_v44  ;;  %v1621_v46 = vpack.c.bf16 %v1596_v44, %v1595_v41  ;;  %v5384_v41 = vld [vmem:[%s6744_s2 + $0x3a0] sm:$0xff]   ;;  %v5387_v44 = vld [vmem:[%s6744_s2 + $0x388] sm:$0xff]  }
 0x3cf   : > { %4878 = vmatmul.mubr.bf16.vlgmr.msra.gmra.mxu0 %v1621_v46 }
 0x3d0   : > { %4902 = vmatpush3.bf16.msra.mxu0 %v5357_v45  ;;  %4917 = vmatprep.mubr.msk.bf16.mxu0 %vm5549_vm2, %v5776_v9  ;;  %v1599_v49 = vld [vmem:[#allocation4] sm:$0xff]  ;;  %v5388_v45 = vld [vmem:[%s6744_s2 + $0x380] sm:$0xff]  }
 0x3d1   : > { %4903 = vmatprep.subr.bf16.mxu0 %v5776_v9 }
 0x3d4   : > { %v1600_v50 = vld [vmem:[#allocation4 + $0x8] sm:$0xff]  ;;  %4904 = vmatpush3.bf16.msra.mxu0 %v5358_v47 }
 0x3d5   : > { %v1601_v53 = vpack.c.bf16 %v1600_v50, %v1599_v49  ;;  %4905 = vmatprep.subr.bf16.mxu0 %v5776_v9  ;;  %v1817_v57 = vld [vmem:[#allocation4 + $0x2] sm:$0xff]  ;;  %v1818_v58 = vld [vmem:[#allocation4 + $0xa] sm:$0xff] }
 0x3d6   : > { %v1819_v59 = vpack.c.bf16 %v1818_v58, %v1817_v57  ;;  %v5389_v50 = vld [vmem:[%s6744_s2 + $0x438] sm:$0xff]   ;;  %v5399_v57 = vld [vmem:[%s6744_s2 + $0x410] sm:$0xff]   ;;  %v5396_v58 = vld [vmem:[%s6744_s2 + $0x3e0] sm:$0xff]  }
 0x3d7   : > { %4898 = vmatmul.mubr.bf16.vlgmr.msra.gmra.mxu1 %v1601_v53  ;;  %v5391_v53 = vld [vmem:[%s6744_s2 + $0x430] sm:$0xff]  }
 0x3d8   : > { %4906 = vmatpush3.bf16.msra.mxu0 %v5359_v51  ;;  %4937 = vmatprep.mubr.msk.bf16.mxu1 %vm5549_vm2, %v5776_v9  ;;  %v5390_v51 = vld [vmem:[%s6744_s2 + $0x3f8] sm:$0xff]  }
 0x3d9   : > { %4907 = vmatprep.subr.bf16.mxu0 %v5776_v9  ;;  %4922 = vmatpush3.bf16.msra.mxu1 %v5365_v60  ;;  %v5398_v60 = vld [vmem:[%s6744_s2 + $0x3d8] sm:$0xff]  }
 0x3da   : > { %4923 = vmatprep.subr.bf16.mxu1 %v5776_v9 }
 0x3dc   : > { %4908 = vmatpush3.bf16.msra.mxu0 %v5360_v54  ;;  %v5392_v54 = vld [vmem:[%s6744_s2 + $0x3f0] sm:$0xff]  }
 0x3dd   : > { %4909 = vmatprep.subr.bf16.mxu0 %v5776_v9  ;;  %4924 = vmatpush3.bf16.msra.mxu1 %v5367_v62  ;;  %v5400_v62 = vld [vmem:[%s6744_s2 + $0x3d0] sm:$0xff]  }
 0x3de   : > { %4925 = vmatprep.subr.bf16.mxu1 %v5776_v9 }
 0x3e0   : > { %4910 = vmatpush3.bf16.msra.mxu0 %v5361_v1  ;;  %v5393_v1 = vld [vmem:[%s6744_s2 + $0x428] sm:$0xff]  }
 0x3e1   : > { %4911 = vmatprep.subr.bf16.mxu0 %v5776_v9  ;;  %4926 = vmatpush3.bf16.msra.mxu1 %v5369_v0  ;;  %v5404_v0 = vld [vmem:[%s6744_s2 + $0x3c0] sm:$0xff]  }
 0x3e2   : > { %4927 = vmatprep.subr.bf16.mxu1 %v5776_v9 }
 0x3e4   : > { %4912 = vmatpush3.bf16.msra.mxu0 %v5362_v5  ;;  %v5394_v5 = vld [vmem:[%s6744_s2 + $0x3e8] sm:$0xff]  }
 0x3e5   : > { %4913 = vmatprep.subr.bf16.mxu0 %v5776_v9  ;;  %4928 = vmatpush3.bf16.msra.mxu1 %v5371_v3 }
 0x3e6   : > { %4929 = vmatprep.subr.bf16.mxu1 %v5776_v9 }
 0x3e8   : > { %4914 = vmatpush3.bf16.msra.mxu0 %v5363_v55  ;;  %v5395_v55 = vld [vmem:[%s6744_s2 + $0x420] sm:$0xff]  }
 0x3e9   : > { %4915 = vmatprep.subr.bf16.mxu0 %v5776_v9  ;;  %4930 = vmatpush3.bf16.msra.mxu1 %v5373_v4 }
 0x3ea   : > { %4931 = vmatprep.subr.bf16.mxu1 %v5776_v9 }
 0x3ec   : > { %4916 = vmatpush3.bf16.msra.mxu0 %v5364_v56  ;;  %v5397_v56 = vld [vmem:[%s6744_s2 + $0x418] sm:$0xff]  }
 0x3ed   : > { %4941 = vmatprep.subr.bf16.mxu0 %v5776_v9  ;;  %4932 = vmatpush3.bf16.msra.mxu1 %v5375_v6 }
 0x3ee   : > { %4933 = vmatprep.subr.bf16.mxu1 %v5776_v9 }
 0x3ef   : > { %4918 = vmatmul.mubr.bf16.vlgmr.msra.gmra.mxu0 %v1819_v59  ;;  %v5401_v59 = vld [vmem:[%s6744_s2 + $0x408] sm:$0xff]  }
 0x3f0   : > { %4957 = vmatprep.mubr.msk.bf16.mxu0 %vm5549_vm2, %v5776_v9  ;;  %4942 = vmatpush3.bf16.msra.mxu0 %v5366_v61  ;;  %v5403_v61 = vld [vmem:[%s6744_s2 + $0x400] sm:$0xff]  }
 0x3f1   : > { %4943 = vmatprep.subr.bf16.mxu0 %v5776_v9  ;;  %4934 = vmatpush3.bf16.msra.mxu1 %v5377_v8 }
 0x3f2   : > { %4935 = vmatprep.subr.bf16.mxu1 %v5776_v9 }
 0x3f4   : > { %4944 = vmatpush3.bf16.msra.mxu0 %v5368_v63  ;;  %v5402_v63 = vld [vmem:[%s6744_s2 + $0x3c8] sm:$0xff]  }
 0x3f5   : > { %4945 = vmatprep.subr.bf16.mxu0 %v5776_v9  ;;  %4936 = vmatpush3.bf16.msra.mxu1 %v5379_v11 }
 0x3f6   : > { %4961 = vmatprep.subr.bf16.mxu1 %v5776_v9 }
 0x3f8   : > { %4946 = vmatpush3.bf16.msra.mxu0 %v5370_v2 }
 0x3f9   : > { %4947 = vmatprep.subr.bf16.mxu0 %v5776_v9 }
 0x3fc   : > { %4948 = vmatpush3.bf16.msra.mxu0 %v5372_v7 }
 0x3fd   : > { %4949 = vmatprep.subr.bf16.mxu0 %v5776_v9 }
 0x400   : > { %4950 = vmatpush3.bf16.msra.mxu0 %v5374_v10 }
 0x401   : > { %4951 = vmatprep.subr.bf16.mxu0 %v5776_v9 }
 0x404   : > { %4952 = vmatpush3.bf16.msra.mxu0 %v5376_v12 }
 0x405   : > { %4953 = vmatprep.subr.bf16.mxu0 %v5776_v9 }
 0x408   : > { %4954 = vmatpush3.bf16.msra.mxu0 %v5378_v13 }
 0x409   : > { %4955 = vmatprep.subr.bf16.mxu0 %v5776_v9 }
 0x40c   : > { %4956 = vmatpush3.bf16.msra.mxu0 %v5380_v14  ;;  %v4112_v14 = vld [vmem:[%s6746_s4 + $0x5] ss:$0 sm:$0xff] }
 0x40d   : > { %4981 = vmatprep.subr.bf16.mxu0 %v5776_v9 }
 0x48f   : > { %v1721_v15 = vpop.f32.mrf.mxu0 }
 0x491   : > { %v4879_v16 = vpop.f32.mrf.mxu0 }
 0x492   : > { %v4113_v16 = vld [vmem:[%s6747_s5 + $0x2] ss:$0 sm:$0xff] }
 0x493   : > { %v1724_v17 = vpop.f32.mrf.mxu0 }
 0x495   : > { %v4880_v18 = vpop.f32.mrf.mxu0 }
 0x497   : > { %v1810_v19 = vpop.f32.mrf.mxu1 }
 0x498   : > { %v1811_v23 = vadd.f32 %v1810_v19, %v1721_v15 }
 0x499   : > { %v4899_v20 = vpop.f32.mrf.mxu1 }
 0x49b   : > { %v1813_v21 = vpop.f32.mrf.mxu1 }
 0x49c   : > { %v1814_v28 = vadd.f32 %v1813_v21, %v1724_v17 }
 0x49d   : > { %v4900_v22 = vpop.f32.mrf.mxu1 }
 0x4af   : > { %v1919_v24 = vpop.f32.mrf.mxu0 }
 0x4b0   : > { %v1926_v26 = vadd.f32 %v1919_v24, %v1811_v23 }
 0x4b1   : > { %v4919_v27 = vpop.f32.mrf.mxu0 }
 0x4b2   : > { %v1933_v29 = vadd.f32 %v4039_v25, %v1926_v26 }
 0x4b3   : > { %v1922_v30 = vpop.f32.mrf.mxu0 }
 0x4b4   : > { %v6209_v31 = vadd.f32 %v1933_v29, %v5986_v48  ;;  %v1927_v32 = vadd.f32 %v1922_v30, %v1814_v28  ;;  %v5382_v48 = vld [vmem:[%s6744_s2 + $0x3b0] sm:$0xff]   ;;  %v5405_v28 = vld [vmem:[%s6744_s2 + $0x478] sm:$0xff]  }
 0x4b5   : > { %v4920_v33 = vpop.f32.mrf.mxu0  ;;  %v5406_v30 = vld [vmem:[%s6744_s2 + $0x470] sm:$0xff]  }
 0x4b6   : > { %1939 = vst [vmem:[#allocation3 + $0x1] sm:$0xff] %v6209_v31  ;;  %v1934_v34 = vadd.f32 %v4039_v25, %v1927_v32 }
 0x4b8   : > { %v6213_v35 = vadd.f32 %v1934_v34, %v5990_v52  ;;  %v5407_v34 = vld [vmem:[%s6744_s2 + $0x468] sm:$0xff]  }
 0x4ba   : > { %1940 = vst [vmem:[#allocation3 + $0x9] sm:$0xff] %v6213_v35  ;;  %v1963_v37 = vpack.c.bf16 %v6213_v35, %v6209_v31 }
 0x4bc   : > { %4938 = vmatmul.mubr.bf16.vlgmr.msra.gmra.mxu1 %v1963_v37  ;;  %v5408_v37 = vld [vmem:[%s6744_s2 + $0x460] sm:$0xff]  }
 0x4bd   : > { %4962 = vmatpush3.bf16.msra.mxu1 %v5381_v36  ;;  %4977 = vmatprep.mubr.msk.bf16.mxu1 %vm5549_vm2, %v5776_v9  ;;  %v1941_v52 = vld [vmem:[#allocation3] sm:$0xff] }
 0x4be   : > { %4963 = vmatprep.subr.bf16.mxu1 %v5776_v9 }
 0x4c1   : > { %v1942_v38 = vld [vmem:[#allocation3 + $0x8] sm:$0xff]  ;;  %4964 = vmatpush3.bf16.msra.mxu1 %v5382_v48  ;;  %v5409_v48 = vld [vmem:[%s6744_s2 + $0x458] sm:$0xff]  }
 0x4c2   : > { %v1943_v40 = vpack.c.bf16 %v1942_v38, %v1941_v52  ;;  %4965 = vmatprep.subr.bf16.mxu1 %v5776_v9  ;;  %v2159_v46 = vld [vmem:[#allocation3 + $0x2] sm:$0xff]  ;;  %v2160_v47 = vld [vmem:[#allocation3 + $0xa] sm:$0xff]  ;;  %v5410_v52 = vld [vmem:[%s6744_s2 + $0x450] sm:$0xff]  }
 0x4c3   : > { %v2161_v49 = vpack.c.bf16 %v2160_v47, %v2159_v46  ;;  %v5411_v38 = vld [vmem:[%s6744_s2 + $0x448] sm:$0xff]   ;;  %v5416_v46 = vld [vmem:[%s6744_s2 + $0x4b0] sm:$0xff]  }
 0x4c4   : > { %4958 = vmatmul.mubr.bf16.vlgmr.msra.gmra.mxu0 %v1943_v40  ;;  %v5417_v47 = vld [vmem:[%s6744_s2 + $0x4e8] sm:$0xff]  }
 0x4c5   : > { %4966 = vmatpush3.bf16.msra.mxu1 %v5383_v39  ;;  %4997 = vmatprep.mubr.msk.bf16.mxu0 %vm5549_vm2, %v5776_v9  ;;  %v5412_v39 = vld [vmem:[%s6744_s2 + $0x440] sm:$0xff]  }
 0x4c6   : > { %4967 = vmatprep.subr.bf16.mxu1 %v5776_v9  ;;  %4982 = vmatpush3.bf16.msra.mxu0 %v5389_v50  ;;  %v5419_v50 = vld [vmem:[%s6744_s2 + $0x4e0] sm:$0xff]  }
 0x4c7   : > { %4983 = vmatprep.subr.bf16.mxu0 %v5776_v9 }
 0x4c9   : > { %4968 = vmatpush3.bf16.msra.mxu1 %v5384_v41 }
 0x4ca   : > { %4969 = vmatprep.subr.bf16.mxu1 %v5776_v9  ;;  %4984 = vmatpush3.bf16.msra.mxu0 %v5391_v53  ;;  %v5423_v53 = vld [vmem:[%s6744_s2 + $0x4d0] sm:$0xff]  }
 0x4cb   : > { %4985 = vmatprep.subr.bf16.mxu0 %v5776_v9 }
 0x4cd   : > { %4970 = vmatpush3.bf16.msra.mxu1 %v5385_v42 }
 0x4ce   : > { %4971 = vmatprep.subr.bf16.mxu1 %v5776_v9  ;;  %4986 = vmatpush3.bf16.msra.mxu0 %v5393_v1  ;;  %v5425_v1 = vld [vmem:[%s6744_s2 + $0x4c8] sm:$0xff]  }
 0x4cf   : > { %4987 = vmatprep.subr.bf16.mxu0 %v5776_v9 }
 0x4d1   : > { %4972 = vmatpush3.bf16.msra.mxu1 %v5386_v43  ;;  %v5413_v43 = vld [vmem:[%s6744_s2 + $0x4f8] sm:$0xff]  }
 0x4d2   : > { %4973 = vmatprep.subr.bf16.mxu1 %v5776_v9  ;;  %4988 = vmatpush3.bf16.msra.mxu0 %v5395_v55  ;;  %v5427_v55 = vld [vmem:[%s6744_s2 + $0x4c0] sm:$0xff]  }
 0x4d3   : > { %4989 = vmatprep.subr.bf16.mxu0 %v5776_v9 }
 0x4d5   : > { %4974 = vmatpush3.bf16.msra.mxu1 %v5387_v44  ;;  %v5414_v44 = vld [vmem:[%s6744_s2 + $0x4b8] sm:$0xff]  }
 0x4d6   : > { %4975 = vmatprep.subr.bf16.mxu1 %v5776_v9  ;;  %4990 = vmatpush3.bf16.msra.mxu0 %v5397_v56  ;;  %v5424_v56 = vld [vmem:[%s6744_s2 + $0x490] sm:$0xff]  }
 0x4d7   : > { %4991 = vmatprep.subr.bf16.mxu0 %v5776_v9 }
 0x4d9   : > { %4976 = vmatpush3.bf16.msra.mxu1 %v5388_v45  ;;  %v5415_v45 = vld [vmem:[%s6744_s2 + $0x4f0] sm:$0xff]  }
 0x4da   : > { %5001 = vmatprep.subr.bf16.mxu1 %v5776_v9  ;;  %4992 = vmatpush3.bf16.msra.mxu0 %v5399_v57  ;;  %v5426_v57 = vld [vmem:[%s6744_s2 + $0x488] sm:$0xff]  }
 0x4db   : > { %4993 = vmatprep.subr.bf16.mxu0 %v5776_v9 }
 0x4dc   : > { %4978 = vmatmul.mubr.bf16.vlgmr.msra.gmra.mxu1 %v2161_v49  ;;  %v5418_v49 = vld [vmem:[%s6744_s2 + $0x4a8] sm:$0xff]  }
 0x4dd   : > { %5017 = vmatprep.mubr.msk.bf16.mxu1 %vm5549_vm2, %v5776_v9  ;;  %5002 = vmatpush3.bf16.msra.mxu1 %v5390_v51  ;;  %v5421_v51 = vld [vmem:[%s6744_s2 + $0x4d8] sm:$0xff]  }
 0x4de   : > { %5003 = vmatprep.subr.bf16.mxu1 %v5776_v9  ;;  %4994 = vmatpush3.bf16.msra.mxu0 %v5401_v59 }
 0x4df   : > { %4995 = vmatprep.subr.bf16.mxu0 %v5776_v9 }
 0x4e1   : > { %5004 = vmatpush3.bf16.msra.mxu1 %v5392_v54  ;;  %v5420_v54 = vld [vmem:[%s6744_s2 + $0x4a0] sm:$0xff]  }
 0x4e2   : > { %5005 = vmatprep.subr.bf16.mxu1 %v5776_v9  ;;  %4996 = vmatpush3.bf16.msra.mxu0 %v5403_v61 }
 0x4e3   : > { %5021 = vmatprep.subr.bf16.mxu0 %v5776_v9 }
 0x4e5   : > { %5006 = vmatpush3.bf16.msra.mxu1 %v5394_v5  ;;  %v5422_v5 = vld [vmem:[%s6744_s2 + $0x498] sm:$0xff]  }
 0x4e6   : > { %5007 = vmatprep.subr.bf16.mxu1 %v5776_v9 }
 0x4e9   : > { %5008 = vmatpush3.bf16.msra.mxu1 %v5396_v58  ;;  %v5428_v58 = vld [vmem:[%s6744_s2 + $0x480] sm:$0xff]  }
 0x4ea   : > { %5009 = vmatprep.subr.bf16.mxu1 %v5776_v9 }
 0x4ed   : > { %5010 = vmatpush3.bf16.msra.mxu1 %v5398_v60 }
 0x4ee   : > { %5011 = vmatprep.subr.bf16.mxu1 %v5776_v9 }
 0x4f1   : > { %5012 = vmatpush3.bf16.msra.mxu1 %v5400_v62 }
 0x4f2   : > { %5013 = vmatprep.subr.bf16.mxu1 %v5776_v9 }
 0x4f5   : > { %5014 = vmatpush3.bf16.msra.mxu1 %v5402_v63 }
 0x4f6   : > { %5015 = vmatprep.subr.bf16.mxu1 %v5776_v9 }
 0x4f9   : > { %5016 = vmatpush3.bf16.msra.mxu1 %v5404_v0 }
 0x4fa   : > { %5041 = vmatprep.subr.bf16.mxu1 %v5776_v9 }
 0x57c   : > { %v2063_v2 = vpop.f32.mrf.mxu1 }
 0x57e   : > { %v4939_v3 = vpop.f32.mrf.mxu1 }
 0x580   : > { %v2066_v4 = vpop.f32.mrf.mxu1 }
 0x582   : > { %v4940_v6 = vpop.f32.mrf.mxu1 }
 0x584   : > { %v2152_v7 = vpop.f32.mrf.mxu0 }
 0x585   : > { %v2153_v12 = vadd.f32 %v2152_v7, %v2063_v2  ;;  %v4186_v7 = vld [vmem:[%s6746_s4 + $0x6] ss:$0 sm:$0xff] }
 0x586   : > { %v4959_v8 = vpop.f32.mrf.mxu0 }
 0x588   : > { %v2155_v10 = vpop.f32.mrf.mxu0 }
 0x589   : > { %v2156_v18 = vadd.f32 %v2155_v10, %v2066_v4 }
 0x58a   : > { %v4960_v11 = vpop.f32.mrf.mxu0 }
 0x59c   : > { %v2261_v13 = vpop.f32.mrf.mxu1 }
 0x59d   : > { %v2268_v15 = vadd.f32 %v2261_v13, %v2153_v12 }
 0x59e   : > { %v4979_v17 = vpop.f32.mrf.mxu1 }
 0x59f   : > { %v2275_v19 = vadd.f32 %v4112_v14, %v2268_v15 }
 0x5a0   : > { %v2264_v20 = vpop.f32.mrf.mxu1 }
 0x5a1   : > { %vm2277_vm7 = vcmp.ge.f32.partialorder %v2275_v19, 0.0  ;;  %v2284_v21 = vmul.f32 %v4113_v16, %v2275_v19  ;;  %v2269_v22 = vadd.f32 %v2264_v20, %v2156_v18 }
 0x5a2   : > { %v4980_v23 = vpop.f32.mrf.mxu1 }
 0x5a3   : > { %v2286_v24 = vsel %vm2277_vm7, %v2275_v19, %v2284_v21  ;;  %v2276_v25 = vadd.f32 %v4112_v14, %v2269_v22  ;;  %v5429_v19 = vld [vmem:[%s6744_s2 + $0x538] sm:$0xff]   ;;  %v5431_v22 = vld [vmem:[%s6744_s2 + $0x528] sm:$0xff]  }
 0x5a4   : > { %2288 = vst [vmem:[#allocation4 + $0x1] sm:$0xff] %v2286_v24 }
 0x5a5   : > { %vm2278_vm8 = vcmp.ge.f32.partialorder %v2276_v25, 0.0  ;;  %v2285_v26 = vmul.f32 %v4113_v16, %v2276_v25 }
 0x5a7   : > { %v2287_v27 = vsel %vm2278_vm8, %v2276_v25, %v2285_v26  ;;  %v5433_v25 = vld [vmem:[%s6744_s2 + $0x518] sm:$0xff]   ;;  %v5434_v26 = vld [vmem:[%s6744_s2 + $0x510] sm:$0xff]  }
 0x5a8   : > { %2289 = vst [vmem:[#allocation4 + $0x9] sm:$0xff] %v2287_v27  ;;  %v2312_v29 = vpack.c.bf16 %v2287_v27, %v2286_v24  ;;  %v5432_v24 = vld [vmem:[%s6744_s2 + $0x520] sm:$0xff]   ;;  %v5435_v27 = vld [vmem:[%s6744_s2 + $0x508] sm:$0xff]  }
 0x5aa   : > { %4998 = vmatmul.mubr.bf16.vlgmr.msra.gmra.mxu0 %v2312_v29 }
 0x5ab   : > { %5022 = vmatpush3.bf16.msra.mxu0 %v5405_v28  ;;  %5037 = vmatprep.mubr.msk.bf16.mxu0 %vm5549_vm2, %v5776_v9  ;;  %v2290_v32 = vld [vmem:[#allocation4] sm:$0xff]  ;;  %v5436_v28 = vld [vmem:[%s6744_s2 + $0x500] sm:$0xff]  }
 0x5ac   : > { %5023 = vmatprep.subr.bf16.mxu0 %v5776_v9 }
 0x5af   : > { %v2291_v33 = vld [vmem:[#allocation4 + $0x8] sm:$0xff]  ;;  %5024 = vmatpush3.bf16.msra.mxu0 %v5406_v30 }
 0x5b0   : > { %v2292_v36 = vpack.c.bf16 %v2291_v33, %v2290_v32  ;;  %5025 = vmatprep.subr.bf16.mxu0 %v5776_v9  ;;  %v2508_v40 = vld [vmem:[#allocation4 + $0x2] sm:$0xff]  ;;  %v2509_v41 = vld [vmem:[#allocation4 + $0xa] sm:$0xff] }
 0x5b1   : > { %v2510_v42 = vpack.c.bf16 %v2509_v41, %v2508_v40  ;;  %v5437_v33 = vld [vmem:[%s6744_s2 + $0x5b8] sm:$0xff]   ;;  %v5447_v40 = vld [vmem:[%s6744_s2 + $0x590] sm:$0xff]   ;;  %v5444_v41 = vld [vmem:[%s6744_s2 + $0x560] sm:$0xff]  }
 0x5b2   : > { %5018 = vmatmul.mubr.bf16.vlgmr.msra.gmra.mxu1 %v2292_v36  ;;  %v5439_v36 = vld [vmem:[%s6744_s2 + $0x5b0] sm:$0xff]  }
 0x5b3   : > { %5026 = vmatpush3.bf16.msra.mxu0 %v5407_v34  ;;  %5057 = vmatprep.mubr.msk.bf16.mxu1 %vm5549_vm2, %v5776_v9  ;;  %v5438_v34 = vld [vmem:[%s6744_s2 + $0x578] sm:$0xff]  }
 0x5b4   : > { %5027 = vmatprep.subr.bf16.mxu0 %v5776_v9  ;;  %5042 = vmatpush3.bf16.msra.mxu1 %v5413_v43  ;;  %v5446_v43 = vld [vmem:[%s6744_s2 + $0x558] sm:$0xff]  }
 0x5b5   : > { %5043 = vmatprep.subr.bf16.mxu1 %v5776_v9 }
 0x5b7   : > { %5028 = vmatpush3.bf16.msra.mxu0 %v5408_v37  ;;  %v5440_v37 = vld [vmem:[%s6744_s2 + $0x570] sm:$0xff]  }
 0x5b8   : > { %5029 = vmatprep.subr.bf16.mxu0 %v5776_v9  ;;  %5044 = vmatpush3.bf16.msra.mxu1 %v5415_v45  ;;  %v5448_v45 = vld [vmem:[%s6744_s2 + $0x550] sm:$0xff]  }
 0x5b9   : > { %5045 = vmatprep.subr.bf16.mxu1 %v5776_v9 }
 0x5bb   : > { %5030 = vmatpush3.bf16.msra.mxu0 %v5409_v48  ;;  %v5441_v48 = vld [vmem:[%s6744_s2 + $0x5a8] sm:$0xff]  }
 0x5bc   : > { %5031 = vmatprep.subr.bf16.mxu0 %v5776_v9  ;;  %5046 = vmatpush3.bf16.msra.mxu1 %v5417_v47  ;;  %v5452_v47 = vld [vmem:[%s6744_s2 + $0x540] sm:$0xff]  }
 0x5bd   : > { %5047 = vmatprep.subr.bf16.mxu1 %v5776_v9 }
 0x5bf   : > { %5032 = vmatpush3.bf16.msra.mxu0 %v5410_v52  ;;  %v5442_v52 = vld [vmem:[%s6744_s2 + $0x568] sm:$0xff]  }
 0x5c0   : > { %5033 = vmatprep.subr.bf16.mxu0 %v5776_v9  ;;  %5048 = vmatpush3.bf16.msra.mxu1 %v5419_v50 }
 0x5c1   : > { %5049 = vmatprep.subr.bf16.mxu1 %v5776_v9 }
 0x5c3   : > { %5034 = vmatpush3.bf16.msra.mxu0 %v5411_v38  ;;  %v5443_v38 = vld [vmem:[%s6744_s2 + $0x5a0] sm:$0xff]  }
 0x5c4   : > { %5035 = vmatprep.subr.bf16.mxu0 %v5776_v9  ;;  %5050 = vmatpush3.bf16.msra.mxu1 %v5421_v51 }
 0x5c5   : > { %5051 = vmatprep.subr.bf16.mxu1 %v5776_v9 }
 0x5c7   : > { %5036 = vmatpush3.bf16.msra.mxu0 %v5412_v39  ;;  %v5445_v39 = vld [vmem:[%s6744_s2 + $0x598] sm:$0xff]  }
 0x5c8   : > { %5061 = vmatprep.subr.bf16.mxu0 %v5776_v9  ;;  %5052 = vmatpush3.bf16.msra.mxu1 %v5423_v53 }
 0x5c9   : > { %5053 = vmatprep.subr.bf16.mxu1 %v5776_v9 }
 0x5ca   : > { %5038 = vmatmul.mubr.bf16.vlgmr.msra.gmra.mxu0 %v2510_v42  ;;  %v5449_v42 = vld [vmem:[%s6744_s2 + $0x588] sm:$0xff]  }
 0x5cb   : > { %5077 = vmatprep.mubr.msk.bf16.mxu0 %vm5549_vm2, %v5776_v9  ;;  %5062 = vmatpush3.bf16.msra.mxu0 %v5414_v44  ;;  %v5451_v44 = vld [vmem:[%s6744_s2 + $0x580] sm:$0xff]  }
 0x5cc   : > { %5063 = vmatprep.subr.bf16.mxu0 %v5776_v9  ;;  %5054 = vmatpush3.bf16.msra.mxu1 %v5425_v1 }
 0x5cd   : > { %5055 = vmatprep.subr.bf16.mxu1 %v5776_v9 }
 0x5cf   : > { %5064 = vmatpush3.bf16.msra.mxu0 %v5416_v46  ;;  %v5450_v46 = vld [vmem:[%s6744_s2 + $0x548] sm:$0xff]  }
 0x5d0   : > { %5065 = vmatprep.subr.bf16.mxu0 %v5776_v9  ;;  %5056 = vmatpush3.bf16.msra.mxu1 %v5427_v55 }
 0x5d1   : > { %5081 = vmatprep.subr.bf16.mxu1 %v5776_v9 }
 0x5d3   : > { %5066 = vmatpush3.bf16.msra.mxu0 %v5418_v49 }
 0x5d4   : > { %5067 = vmatprep.subr.bf16.mxu0 %v5776_v9 }
 0x5d7   : > { %5068 = vmatpush3.bf16.msra.mxu0 %v5420_v54 }
 0x5d8   : > { %5069 = vmatprep.subr.bf16.mxu0 %v5776_v9 }
 0x5db   : > { %5070 = vmatpush3.bf16.msra.mxu0 %v5422_v5 }
 0x5dc   : > { %5071 = vmatprep.subr.bf16.mxu0 %v5776_v9 }
 0x5df   : > { %5072 = vmatpush3.bf16.msra.mxu0 %v5424_v56 }
 0x5e0   : > { %5073 = vmatprep.subr.bf16.mxu0 %v5776_v9 }
 0x5e3   : > { %5074 = vmatpush3.bf16.msra.mxu0 %v5426_v57 }
 0x5e4   : > { %5075 = vmatprep.subr.bf16.mxu0 %v5776_v9 }
 0x5e7   : > { %5076 = vmatpush3.bf16.msra.mxu0 %v5428_v58  ;;  %v4259_v58 = vld [vmem:[%s6746_s4 + $0x7] ss:$0 sm:$0xff] }
 0x5e8   : > { %5101 = vmatprep.subr.bf16.mxu0 %v5776_v9 }
 0x66a   : > { %v2412_v59 = vpop.f32.mrf.mxu0 }
 0x66c   : > { %v4999_v60 = vpop.f32.mrf.mxu0 }
 0x66d   : > { %v4260_v60 = vld [vmem:[%s6747_s5 + $0x3] ss:$0 sm:$0xff] }
 0x66e   : > { %v2415_v61 = vpop.f32.mrf.mxu0 }
 0x670   : > { %v5000_v62 = vpop.f32.mrf.mxu0 }
 0x672   : > { %v2501_v63 = vpop.f32.mrf.mxu1 }
 0x673   : > { %v2502_v4 = vadd.f32 %v2501_v63, %v2412_v59 }
 0x674   : > { %v5019_v0 = vpop.f32.mrf.mxu1 }
 0x676   : > { %v2504_v2 = vpop.f32.mrf.mxu1 }
 0x677   : > { %v2505_v11 = vadd.f32 %v2504_v2, %v2415_v61 }
 0x678   : > { %v5020_v3 = vpop.f32.mrf.mxu1 }
 0x68a   : > { %v2610_v6 = vpop.f32.mrf.mxu0 }
 0x68b   : > { %v2617_v8 = vadd.f32 %v2610_v6, %v2502_v4 }
 0x68c   : > { %v5039_v10 = vpop.f32.mrf.mxu0 }
 0x68d   : > { %v2624_v12 = vadd.f32 %v4186_v7, %v2617_v8 }
 0x68e   : > { %v2613_v13 = vpop.f32.mrf.mxu0 }
 0x68f   : > { %v6432_v14 = vadd.f32 %v2624_v12, %v6209_v31  ;;  %v2618_v15 = vadd.f32 %v2613_v13, %v2505_v11  ;;  %v5430_v31 = vld [vmem:[%s6744_s2 + $0x530] sm:$0xff]   ;;  %v5453_v11 = vld [vmem:[%s6744_s2 + $0x5f8] sm:$0xff]  }
 0x690   : > { %v5040_v16 = vpop.f32.mrf.mxu0  ;;  %v5454_v13 = vld [vmem:[%s6744_s2 + $0x5f0] sm:$0xff]  }
 0x691   : > { %2630 = vst [vmem:[#allocation3 + $0x1] sm:$0xff] %v6432_v14  ;;  %v2625_v17 = vadd.f32 %v4186_v7, %v2618_v15 }
 0x693   : > { %v6436_v18 = vadd.f32 %v2625_v17, %v6213_v35  ;;  %v5455_v17 = vld [vmem:[%s6744_s2 + $0x5e8] sm:$0xff]  }
 0x695   : > { %2631 = vst [vmem:[#allocation3 + $0x9] sm:$0xff] %v6436_v18  ;;  %v2654_v20 = vpack.c.bf16 %v6436_v18, %v6432_v14 }
 0x697   : > { %5058 = vmatmul.mubr.bf16.vlgmr.msra.gmra.mxu1 %v2654_v20  ;;  %v5456_v20 = vld [vmem:[%s6744_s2 + $0x5e0] sm:$0xff]  }
 0x698   : > { %5082 = vmatpush3.bf16.msra.mxu1 %v5429_v19  ;;  %5097 = vmatprep.mubr.msk.bf16.mxu1 %vm5549_vm2, %v5776_v9  ;;  %v2632_v35 = vld [vmem:[#allocation3] sm:$0xff] }
 0x699   : > { %5083 = vmatprep.subr.bf16.mxu1 %v5776_v9 }
 0x69c   : > { %v2633_v21 = vld [vmem:[#allocation3 + $0x8] sm:$0xff]  ;;  %5084 = vmatpush3.bf16.msra.mxu1 %v5430_v31  ;;  %v5457_v31 = vld [vmem:[%s6744_s2 + $0x5d8] sm:$0xff]  }
 0x69d   : > { %v2634_v23 = vpack.c.bf16 %v2633_v21, %v2632_v35  ;;  %5085 = vmatprep.subr.bf16.mxu1 %v5776_v9  ;;  %v2850_v29 = vld [vmem:[#allocation3 + $0x2] sm:$0xff]  ;;  %v2851_v30 = vld [vmem:[#allocation3 + $0xa] sm:$0xff]  ;;  %v5458_v35 = vld [vmem:[%s6744_s2 + $0x5d0] sm:$0xff]  }
 0x69e   : > { %v2852_v32 = vpack.c.bf16 %v2851_v30, %v2850_v29  ;;  %v5459_v21 = vld [vmem:[%s6744_s2 + $0x5c8] sm:$0xff]   ;;  %v5464_v29 = vld [vmem:[%s6745_s3 + $0x30] sm:$0xff]  }
 0x69f   : > { %5078 = vmatmul.mubr.bf16.vlgmr.msra.gmra.mxu0 %v2634_v23  ;;  %v5465_v30 = vld [vmem:[%s6745_s3 + $0x68] sm:$0xff]  }
 0x6a0   : > { %5086 = vmatpush3.bf16.msra.mxu1 %v5431_v22  ;;  %5117 = vmatprep.mubr.msk.bf16.mxu0 %vm5549_vm2, %v5776_v9  ;;  %v5460_v22 = vld [vmem:[%s6744_s2 + $0x5c0] sm:$0xff]  }
 0x6a1   : > { %5087 = vmatprep.subr.bf16.mxu1 %v5776_v9  ;;  %5102 = vmatpush3.bf16.msra.mxu0 %v5437_v33  ;;  %v5467_v33 = vld [vmem:[%s6745_s3 + $0x60] sm:$0xff]  }
 0x6a2   : > { %5103 = vmatprep.subr.bf16.mxu0 %v5776_v9 }
 0x6a4   : > { %5088 = vmatpush3.bf16.msra.mxu1 %v5432_v24 }
 0x6a5   : > { %5089 = vmatprep.subr.bf16.mxu1 %v5776_v9  ;;  %5104 = vmatpush3.bf16.msra.mxu0 %v5439_v36  ;;  %v5471_v36 = vld [vmem:[%s6745_s3 + $0x50] sm:$0xff]  }
 0x6a6   : > { %5105 = vmatprep.subr.bf16.mxu0 %v5776_v9 }
 0x6a8   : > { %5090 = vmatpush3.bf16.msra.mxu1 %v5433_v25 }
 0x6a9   : > { %5091 = vmatprep.subr.bf16.mxu1 %v5776_v9  ;;  %5106 = vmatpush3.bf16.msra.mxu0 %v5441_v48  ;;  %v5473_v48 = vld [vmem:[%s6745_s3 + $0x48] sm:$0xff]  }
 0x6aa   : > { %5107 = vmatprep.subr.bf16.mxu0 %v5776_v9 }
 0x6ac   : > { %5092 = vmatpush3.bf16.msra.mxu1 %v5434_v26  ;;  %v5461_v26 = vld [vmem:[%s6745_s3 + $0x78] sm:$0xff]  }
 0x6ad   : > { %5093 = vmatprep.subr.bf16.mxu1 %v5776_v9  ;;  %5108 = vmatpush3.bf16.msra.mxu0 %v5443_v38  ;;  %v5475_v38 = vld [vmem:[%s6745_s3 + $0x40] sm:$0xff]  }
 0x6ae   : > { %5109 = vmatprep.subr.bf16.mxu0 %v5776_v9 }
 0x6b0   : > { %5094 = vmatpush3.bf16.msra.mxu1 %v5435_v27  ;;  %v5462_v27 = vld [vmem:[%s6745_s3 + $0x38] sm:$0xff]  }
 0x6b1   : > { %5095 = vmatprep.subr.bf16.mxu1 %v5776_v9  ;;  %5110 = vmatpush3.bf16.msra.mxu0 %v5445_v39  ;;  %v5472_v39 = vld [vmem:[%s6745_s3 + $0x10] sm:$0xff]  }
 0x6b2   : > { %5111 = vmatprep.subr.bf16.mxu0 %v5776_v9 }
 0x6b4   : > { %5096 = vmatpush3.bf16.msra.mxu1 %v5436_v28  ;;  %v5463_v28 = vld [vmem:[%s6745_s3 + $0x70] sm:$0xff]  }
 0x6b5   : > { %5121 = vmatprep.subr.bf16.mxu1 %v5776_v9  ;;  %5112 = vmatpush3.bf16.msra.mxu0 %v5447_v40  ;;  %v5474_v40 = vld [vmem:[%s6745_s3 + $0x8] sm:$0xff]  }
 0x6b6   : > { %5113 = vmatprep.subr.bf16.mxu0 %v5776_v9 }
 0x6b7   : > { %5098 = vmatmul.mubr.bf16.vlgmr.msra.gmra.mxu1 %v2852_v32  ;;  %v5466_v32 = vld [vmem:[%s6745_s3 + $0x28] sm:$0xff]  }
 0x6b8   : > { %5137 = vmatprep.mubr.msk.bf16.mxu1 %vm5549_vm2, %v5776_v9  ;;  %5122 = vmatpush3.bf16.msra.mxu1 %v5438_v34  ;;  %v5469_v34 = vld [vmem:[%s6745_s3 + $0x58] sm:$0xff]  }
 0x6b9   : > { %5123 = vmatprep.subr.bf16.mxu1 %v5776_v9  ;;  %5114 = vmatpush3.bf16.msra.mxu0 %v5449_v42 }
 0x6ba   : > { %5115 = vmatprep.subr.bf16.mxu0 %v5776_v9 }
 0x6bc   : > { %5124 = vmatpush3.bf16.msra.mxu1 %v5440_v37  ;;  %v5468_v37 = vld [vmem:[%s6745_s3 + $0x20] sm:$0xff]  }
 0x6bd   : > { %5125 = vmatprep.subr.bf16.mxu1 %v5776_v9  ;;  %5116 = vmatpush3.bf16.msra.mxu0 %v5451_v44 }
 0x6be   : > { %5141 = vmatprep.subr.bf16.mxu0 %v5776_v9 }
 0x6c0   : > { %5126 = vmatpush3.bf16.msra.mxu1 %v5442_v52  ;;  %v5470_v52 = vld [vmem:[%s6745_s3 + $0x18] sm:$0xff]  }
 0x6c1   : > { %5127 = vmatprep.subr.bf16.mxu1 %v5776_v9 }
 0x6c4   : > { %5128 = vmatpush3.bf16.msra.mxu1 %v5444_v41  ;;  %v5476_v41 = vld [vmem:[%s6745_s3] sm:$0xff]  }
 0x6c5   : > { %5129 = vmatprep.subr.bf16.mxu1 %v5776_v9 }
 0x6c8   : > { %5130 = vmatpush3.bf16.msra.mxu1 %v5446_v43 }
 0x6c9   : > { %5131 = vmatprep.subr.bf16.mxu1 %v5776_v9 }
 0x6cc   : > { %5132 = vmatpush3.bf16.msra.mxu1 %v5448_v45 }
 0x6cd   : > { %5133 = vmatprep.subr.bf16.mxu1 %v5776_v9 }
 0x6d0   : > { %5134 = vmatpush3.bf16.msra.mxu1 %v5450_v46 }
 0x6d1   : > { %5135 = vmatprep.subr.bf16.mxu1 %v5776_v9 }
 0x6d4   : > { %5136 = vmatpush3.bf16.msra.mxu1 %v5452_v47 }
 0x6d5   : > { %5161 = vmatprep.subr.bf16.mxu1 %v5776_v9 }
 0x757   : > { %v2754_v49 = vpop.f32.mrf.mxu1 }
 0x759   : > { %v5059_v50 = vpop.f32.mrf.mxu1 }
 0x75b   : > { %v2757_v51 = vpop.f32.mrf.mxu1 }
 0x75d   : > { %v5060_v53 = vpop.f32.mrf.mxu1 }
 0x75f   : > { %v2843_v54 = vpop.f32.mrf.mxu0 }
 0x760   : > { %v2844_v56 = vadd.f32 %v2843_v54, %v2754_v49  ;;  %v4333_v54 = vld [vmem:[%s6746_s4 + $0x8] ss:$0 sm:$0xff] }
 0x761   : > { %v5079_v1 = vpop.f32.mrf.mxu0 }
 0x763   : > { %v2846_v5 = vpop.f32.mrf.mxu0 }
 0x764   : > { %v2847_v62 = vadd.f32 %v2846_v5, %v2757_v51 }
 0x765   : > { %v5080_v55 = vpop.f32.mrf.mxu0 }
 0x777   : > { %v2952_v57 = vpop.f32.mrf.mxu1 }
 0x778   : > { %v2959_v59 = vadd.f32 %v2952_v57, %v2844_v56 }
 0x779   : > { %v5099_v61 = vpop.f32.mrf.mxu1 }
 0x77a   : > { %v2966_v63 = vadd.f32 %v4259_v58, %v2959_v59 }
 0x77b   : > { %v2955_v0 = vpop.f32.mrf.mxu1 }
 0x77c   : > { %vm2968_vm9 = vcmp.ge.f32.partialorder %v2966_v63, 0.0  ;;  %v2975_v2 = vmul.f32 %v4260_v60, %v2966_v63  ;;  %v2960_v3 = vadd.f32 %v2955_v0, %v2847_v62 }
 0x77d   : > { %v5100_v4 = vpop.f32.mrf.mxu1 }
 0x77e   : > { %v2977_v6 = vsel %vm2968_vm9, %v2966_v63, %v2975_v2  ;;  %v2967_v7 = vadd.f32 %v4259_v58, %v2960_v3  ;;  %v5477_v63 = vld [vmem:[%s6745_s3 + $0xb8] sm:$0xff]   ;;  %v5478_v2 = vld [vmem:[%s6745_s3 + $0xb0] sm:$0xff]  }
 0x77f   : > { %2979 = vst [vmem:[#allocation4 + $0x1] sm:$0xff] %v2977_v6 }
 0x780   : > { %vm2969_vm10 = vcmp.ge.f32.partialorder %v2967_v7, 0.0  ;;  %v2976_v8 = vmul.f32 %v4260_v60, %v2967_v7 }
 0x782   : > { %v2978_v10 = vsel %vm2969_vm10, %v2967_v7, %v2976_v8  ;;  %v5481_v7 = vld [vmem:[%s6745_s3 + $0x98] sm:$0xff]   ;;  %v5482_v8 = vld [vmem:[%s6745_s3 + $0x90] sm:$0xff]  }
 0x783   : > { %2980 = vst [vmem:[#allocation4 + $0x9] sm:$0xff] %v2978_v10  ;;  %v3003_v12 = vpack.c.bf16 %v2978_v10, %v2977_v6  ;;  %v5480_v6 = vld [vmem:[%s6745_s3 + $0xa0] sm:$0xff]   ;;  %v5483_v10 = vld [vmem:[%s6745_s3 + $0x88] sm:$0xff]  }
 0x785   : > { %5118 = vmatmul.mubr.bf16.vlgmr.msra.gmra.mxu0 %v3003_v12 }
 0x786   : > { %5142 = vmatpush3.bf16.msra.mxu0 %v5453_v11  ;;  %5157 = vmatprep.mubr.msk.bf16.mxu0 %vm5549_vm2, %v5776_v9  ;;  %v2981_v15 = vld [vmem:[#allocation4] sm:$0xff]  ;;  %v5484_v11 = vld [vmem:[%s6745_s3 + $0x80] sm:$0xff]  }
 0x787   : > { %5143 = vmatprep.subr.bf16.mxu0 %v5776_v9 }
 0x78a   : > { %v2982_v16 = vld [vmem:[#allocation4 + $0x8] sm:$0xff]  ;;  %5144 = vmatpush3.bf16.msra.mxu0 %v5454_v13 }
 0x78b   : > { %v2983_v19 = vpack.c.bf16 %v2982_v16, %v2981_v15  ;;  %5145 = vmatprep.subr.bf16.mxu0 %v5776_v9  ;;  %v3199_v23 = vld [vmem:[#allocation4 + $0x2] sm:$0xff]  ;;  %v3200_v24 = vld [vmem:[#allocation4 + $0xa] sm:$0xff] }
 0x78c   : > { %v3201_v25 = vpack.c.bf16 %v3200_v24, %v3199_v23 }
 0x78d   : > { %5138 = vmatmul.mubr.bf16.vlgmr.msra.gmra.mxu1 %v2983_v19 }
 0x78e   : > { %5146 = vmatpush3.bf16.msra.mxu0 %v5455_v17  ;;  %5177 = vmatprep.mubr.msk.bf16.mxu1 %vm5549_vm2, %v5776_v9 }
 0x78f   : > { %5147 = vmatprep.subr.bf16.mxu0 %v5776_v9  ;;  %5162 = vmatpush3.bf16.msra.mxu1 %v5461_v26 }
 0x790   : > { %5163 = vmatprep.subr.bf16.mxu1 %v5776_v9 }
 0x792   : > { %5148 = vmatpush3.bf16.msra.mxu0 %v5456_v20 }
 0x793   : > { %5149 = vmatprep.subr.bf16.mxu0 %v5776_v9  ;;  %5164 = vmatpush3.bf16.msra.mxu1 %v5463_v28 }
 0x794   : > { %5165 = vmatprep.subr.bf16.mxu1 %v5776_v9 }
 0x796   : > { %5150 = vmatpush3.bf16.msra.mxu0 %v5457_v31 }
 0x797   : > { %5151 = vmatprep.subr.bf16.mxu0 %v5776_v9  ;;  %5166 = vmatpush3.bf16.msra.mxu1 %v5465_v30 }
 0x798   : > { %5167 = vmatprep.subr.bf16.mxu1 %v5776_v9 }
 0x79a   : > { %5152 = vmatpush3.bf16.msra.mxu0 %v5458_v35 }
 0x79b   : > { %5153 = vmatprep.subr.bf16.mxu0 %v5776_v9  ;;  %5168 = vmatpush3.bf16.msra.mxu1 %v5467_v33 }
 0x79c   : > { %5169 = vmatprep.subr.bf16.mxu1 %v5776_v9 }
 0x79e   : > { %5154 = vmatpush3.bf16.msra.mxu0 %v5459_v21 }
 0x79f   : > { %5155 = vmatprep.subr.bf16.mxu0 %v5776_v9  ;;  %5170 = vmatpush3.bf16.msra.mxu1 %v5469_v34 }
 0x7a0   : > { %5171 = vmatprep.subr.bf16.mxu1 %v5776_v9 }
 0x7a2   : > { %5156 = vmatpush3.bf16.msra.mxu0 %v5460_v22 }
 0x7a3   : > { %5181 = vmatprep.subr.bf16.mxu0 %v5776_v9  ;;  %5172 = vmatpush3.bf16.msra.mxu1 %v5471_v36 }
 0x7a4   : > { %5173 = vmatprep.subr.bf16.mxu1 %v5776_v9 }
 0x7a5   : > { %5158 = vmatmul.mubr.bf16.vlgmr.msra.gmra.mxu0 %v3201_v25 }
 0x7a6   : > { %5197 = vmatprep.mubr.msk.bf16.mxu0 %vm5549_vm2, %v5776_v9  ;;  %5182 = vmatpush3.bf16.msra.mxu0 %v5462_v27 }
 0x7a7   : > { %5183 = vmatprep.subr.bf16.mxu0 %v5776_v9  ;;  %5174 = vmatpush3.bf16.msra.mxu1 %v5473_v48 }
 0x7a8   : > { %5175 = vmatprep.subr.bf16.mxu1 %v5776_v9 }
 0x7aa   : > { %5184 = vmatpush3.bf16.msra.mxu0 %v5464_v29 }
 0x7ab   : > { %5185 = vmatprep.subr.bf16.mxu0 %v5776_v9  ;;  %5176 = vmatpush3.bf16.msra.mxu1 %v5475_v38 }
 0x7ac   : > { %5201 = vmatprep.subr.bf16.mxu1 %v5776_v9 }
 0x7ae   : > { %5186 = vmatpush3.bf16.msra.mxu0 %v5466_v32 }
 0x7af   : > { %5187 = vmatprep.subr.bf16.mxu0 %v5776_v9 }
 0x7b2   : > { %5188 = vmatpush3.bf16.msra.mxu0 %v5468_v37 }
 0x7b3   : > { %5189 = vmatprep.subr.bf16.mxu0 %v5776_v9 }
 0x7b6   : > { %5190 = vmatpush3.bf16.msra.mxu0 %v5470_v52 }
 0x7b7   : > { %5191 = vmatprep.subr.bf16.mxu0 %v5776_v9 }
 0x7ba   : > { %5192 = vmatpush3.bf16.msra.mxu0 %v5472_v39 }
 0x7bb   : > { %5193 = vmatprep.subr.bf16.mxu0 %v5776_v9 }
 0x7be   : > { %5194 = vmatpush3.bf16.msra.mxu0 %v5474_v40 }
 0x7bf   : > { %5195 = vmatprep.subr.bf16.mxu0 %v5776_v9 }
 0x7c2   : > { %5196 = vmatpush3.bf16.msra.mxu0 %v5476_v41 }
 0x845   : > { %v3103_v42 = vpop.f32.mrf.mxu0 }
 0x847   : > { %v5119_v43 = vpop.f32.mrf.mxu0 }
 0x849   : > { %v3106_v44 = vpop.f32.mrf.mxu0 }
 0x84b   : > { %v5120_v45 = vpop.f32.mrf.mxu0 }
 0x84d   : > { %v3192_v46 = vpop.f32.mrf.mxu1 }
 0x84e   : > { %v3193_v51 = vadd.f32 %v3192_v46, %v3103_v42 }
 0x84f   : > { %v5139_v47 = vpop.f32.mrf.mxu1 }
 0x851   : > { %v3195_v49 = vpop.f32.mrf.mxu1 }
 0x852   : > { %v3196_v55 = vadd.f32 %v3195_v49, %v3106_v44 }
 0x853   : > { %v5140_v50 = vpop.f32.mrf.mxu1 }
 0x865   : > { %v3301_v53 = vpop.f32.mrf.mxu0 }
 0x866   : > { %v3308_v1 = vadd.f32 %v3301_v53, %v3193_v51 }
 0x867   : > { %v5159_v5 = vpop.f32.mrf.mxu0 }
 0x868   : > { %v3315_v56 = vadd.f32 %v4333_v54, %v3308_v1 }
 0x869   : > { %v3304_v57 = vpop.f32.mrf.mxu0 }
 0x86a   : > { %v3319_v58 = vadd.f32 %v3315_v56, %v6432_v14  ;;  %v3309_v59 = vadd.f32 %v3304_v57, %v3196_v55 }
 0x86b   : > { %v5160_v60 = vpop.f32.mrf.mxu0 }
 0x86c   : > { %3321 = vst [vmem:[#allocation3 + $0x1] sm:$0xff] %v3319_v58  ;;  %v3316_v61 = vadd.f32 %v4333_v54, %v3309_v59 }
 0x86e   : > { %v3320_v62 = vadd.f32 %v3316_v61, %v6436_v18  ;;  %v5479_v18 = vld [vmem:[%s6745_s3 + $0xa8] sm:$0xff]  }
 0x870   : > { %3322 = vst [vmem:[#allocation3 + $0x9] sm:$0xff] %v3320_v62  ;;  %v3344_v0 = vpack.c.bf16 %v3320_v62, %v3319_v58 }
 0x872   : > { %5178 = vmatmul.mubr.bf16.vlgmr.msra.gmra.mxu1 %v3344_v0 }
 0x873   : > { %5202 = vmatpush3.bf16.msra.mxu1 %v5477_v63  ;;  %5217 = vmatprep.mubr.msk.bf16.mxu1 %vm5549_vm2, %v5776_v9  ;;  %v3323_v14 = vld [vmem:[#allocation3] sm:$0xff] }
 0x874   : > { %5203 = vmatprep.subr.bf16.mxu1 %v5776_v9 }
 0x877   : > { %v3324_v3 = vld [vmem:[#allocation3 + $0x8] sm:$0xff]  ;;  %5204 = vmatpush3.bf16.msra.mxu1 %v5478_v2 }
 0x878   : > { %v3325_v4 = vpack.c.bf16 %v3324_v3, %v3323_v14  ;;  %5205 = vmatprep.subr.bf16.mxu1 %v5776_v9  ;;  %v3540_v12 = vld [vmem:[#allocation3 + $0x2] sm:$0xff]  ;;  %v3541_v13 = vld [vmem:[#allocation3 + $0xa] sm:$0xff] }
 0x879   : > { %v3542_v15 = vpack.c.bf16 %v3541_v13, %v3540_v12 }
 0x87a   : > { %5198 = vmatmul.mubr.bf16.vlgmr.msra.gmra.mxu0 %v3325_v4 }
 0x87b   : > { %5206 = vmatpush3.bf16.msra.mxu1 %v5479_v18 }
 0x87c   : > { %5207 = vmatprep.subr.bf16.mxu1 %v5776_v9 }
 0x87f   : > { %5208 = vmatpush3.bf16.msra.mxu1 %v5480_v6 }
 0x880   : > { %5209 = vmatprep.subr.bf16.mxu1 %v5776_v9 }
 0x883   : > { %5210 = vmatpush3.bf16.msra.mxu1 %v5481_v7 }
 0x884   : > { %5211 = vmatprep.subr.bf16.mxu1 %v5776_v9 }
 0x887   : > { %5212 = vmatpush3.bf16.msra.mxu1 %v5482_v8 }
 0x888   : > { %5213 = vmatprep.subr.bf16.mxu1 %v5776_v9 }
 0x88b   : > { %5214 = vmatpush3.bf16.msra.mxu1 %v5483_v10 }
 0x88c   : > { %5215 = vmatprep.subr.bf16.mxu1 %v5776_v9  ;;  %v4390_v9 = vld [vmem:[%s6746_s4 + $0x9] ss:$0 sm:$0xff] }
 0x88f   : > { %5216 = vmatpush3.bf16.msra.mxu1 %v5484_v11 }
 0x892   : > { %5218 = vmatmul.mubr.bf16.vlgmr.msra.gmra.mxu1 %v3542_v15 }
 0x932   : > { %v3444_v16 = vpop.f32.mrf.mxu1 }
 0x934   : > { %v5179_v17 = vpop.f32.mrf.mxu1 }
 0x936   : > { %v3447_v19 = vpop.f32.mrf.mxu1 }
 0x938   : > { %v5180_v20 = vpop.f32.mrf.mxu1 }
 0x93a   : > { %v3533_v31 = vpop.f32.mrf.mxu0 }
 0x93b   : > { %v3534_v23 = vadd.f32 %v3533_v31, %v3444_v16 }
 0x93c   : > { %v5199_v35 = vpop.f32.mrf.mxu0 }
 0x93e   : > { %v3536_v21 = vpop.f32.mrf.mxu0 }
 0x93f   : > { %v3537_v27 = vadd.f32 %v3536_v21, %v3447_v19 }
 0x940   : > { %v5200_v22 = vpop.f32.mrf.mxu0 }
 0x952   : > { %v3642_v24 = vpop.f32.mrf.mxu1 }
 0x953   : > { %v3649_v25 = vadd.f32 %v3642_v24, %v3534_v23 }
 0x954   : > { %v5219_v26 = vpop.f32.mrf.mxu1 }
 0x955   : > { %v3656_v28 = vadd.f32 %v4390_v9, %v3649_v25 }
 0x956   : > { %v3645_v29 = vpop.f32.mrf.mxu1 }
 0x957   : > { %3658 = vst.msk [vmem:[%s244_s26] sm:$0xff] %vm251_vm0, %v3656_v28  ;;  %v3650_v30 = vadd.f32 %v3645_v29, %v3537_v27 }
 0x958   : > { %v5220_v32 = vpop.f32.mrf.mxu1 }
 0x959   : > { %v3657_v33 = vadd.f32 %v4390_v9, %v3650_v30 }
 0x95b   : > { %3659 = vst.msk [vmem:[%s244_s26 + $0x8] sm:$0xff] %vm251_vm0, %v3657_v33 }
 0x95c   : > { %5499 = shalt.err (!%p5496_p3)
}
 0x95d   : > { %s5500_s16 = scalar_lea.hbm %s6697_s11, 256  ;;  %s5504_s19 = scalar_lea.hbm %s6748_s6, 512 }
 0x95e   : > { %p5501_p4 = scmp.ne.s32.totalorder %s6697_s11, %s5500_s16  ;;  %p5505_p9 = scmp.lt.s32.totalorder %s6697_s11, %s6748_s6 }
 0x95f   : > { %p5506_p10 = scmp.lt.s32.totalorder %s5504_s19, %s5500_s16 }
 0x960   : > { %p5502_p7 = pnand %p5501_p4, %p5626_p5 }
 0x961   : > { %p5507_p11 = por %p5506_p10, %p5505_p9 }
 0x962   : > { %p5503_p8 = pneg %p5502_p7 }
 0x964   : > { %p5508_p12 = pnand %p5507_p11, %p5503_p8 }
 0x966   : > { %5511 = shalt.err (!%p5508_p12)
}
 0x967   : > { %s5551_s29 = smov 128   ;;  %s5552_s9 = smov 8  }
 0x968   : > { %5221 = dma.vmem_to_hbm [thread:$0]  (%p5626_p5), %s6699_s28, 256, %s6697_s11, %s6702_s12, %s5551_s29, %s5551_s29, %s5552_s9  }
 0x969 PF: > { %p5227_p13 = scmp.ge.s32.totalorder %s5546_s24, 2  ;;  %s3689_s10 = sand.u32 1, %s5534_s21  }
 0x96a   : > { %s3690_s25 = scalar_lea.sflag [#allocation6], %s3689_s10 }
 0x96b   : > { %p5224_p0 = pnand %p5227_p13, %p5630_p6 }
 0x96d   : > { %p5225_p1 = pneg %p5224_p0 }
 0x96f   : > { %5529 = dma.done.wait (%p5225_p1), %s3690_s25, 256  }
 0x970   : > { %5531 = vsyncadd (%p5225_p1), %s3690_s25, 4294967040  ;;  %p16_p2 = scmp.ge.s32.totalorder %s5613_s27, 4   ;;  %s6751_s21 = smov %s5538_s22 }
 0x971   : > { %s6752_s22 = smov %s5542_s23  ;;  %s6753_s23 = smov %s5624_s30 }
 0x972   : > { %s6754_s24 = smov %s5613_s27  ;;  %18 = sbr.rel (!%p16_p2) target bundleno = 3 (0x3), region = 108 }
 0x977   :  { %3695 = vsyncpa [#allocation6], 1 }
 0x978   :  { %3697 = vsyncpa [#allocation6 + $0x1], 1 }

</bundles_post_ra>
